<compile_context>
chip_gen: v5e
topology: v5e:2x2
jax: 0.10.0
libtpu: 0.0.40
codegen_flags: <defaults>
</compile_context>

<pallas_src>
import jax
import jax.numpy as jnp
from jax.experimental import pallas as pl
from jax.experimental.pallas import tpu as pltpu


# ----------------------------------------------------------------------------
# helpers
# ----------------------------------------------------------------------------
def _row_tile(m, cap):
    """Largest row tile <= cap that divides m (multiple of 8), else full m."""
    if m <= cap:
        return m
    for t in (4096, 2048, 1024, 512, 256, 128, 64, 32, 16, 8):
        if t <= cap and m % t == 0:
            return t
    return m  # full extent: legal (block dim == array dim), no tiling


def _pick_tiles(n, m2, row_cap=1024):
    """Batch tile BT and spatial-row tile TM2 for the fused stage-2 kernel.

    Targets an MXU M dim (BT*TM2) of a few hundred rows while keeping the
    bf16 patch block <= ~2.4 MB per buffer (v7x 64 MiB VMEM safe with double
    buffering), and prefers >= 2 batch tiles so both v7x TensorCores get work.
    """
    tm2 = m2
    if m2 > row_cap:
        for t in (1024, 512, 256, 128, 64, 32, 16, 8):
            if t <= row_cap and m2 % t == 0:
                tm2 = t
                break
    bt_cap = max(1, row_cap // tm2)
    bt = 1
    for t in range(min(n, bt_cap), 0, -1):
        if n % t == 0:
            bt = t
            break
    # keep >= 2 parallel batch tiles when the MXU stays reasonably full
    if n // bt < 2 and n > 1:
        for t in range(bt // 2, 0, -1):
            if n % t == 0 and t * tm2 >= 256:
                bt = t
                break
    return bt, tm2


def im2col(x_nhwc, k=3, stride=2, pad=1):
    """NHWC -> (N, Ho*Wo, k*k*C); patch feature order = (kh, kw, in_c)."""
    n, h, w, c = x_nhwc.shape
    xp = jnp.pad(x_nhwc, ((0, 0), (pad, pad), (pad, pad), (0, 0)))
    ho = (h + 2 * pad - k) // stride + 1
    wo = (w + 2 * pad - k) // stride + 1
    taps = []
    for di in range(k):
        for dj in range(k):
            taps.append(xp[:, di:di + stride * ho:stride,
                           dj:dj + stride * wo:stride, :])
    patches = jnp.stack(taps, axis=3)                 # (N, Ho, Wo, k*k, C)
    return patches.reshape(n, ho * wo, k * k * c), ho, wo


def conv_weight_to_matrix(w_oihw):
    """PyTorch conv weight (O,I,kh,kw) -> (kh*kw*I, O) matching im2col order."""
    o, i, kh, kw = w_oihw.shape
    return jnp.transpose(w_oihw, (2, 3, 1, 0)).reshape(kh * kw * i, o)


# ----------------------------------------------------------------------------
# Kernel 1: conv1 as tiled matmul + LeakyReLU (bf16 in, f32 acc, bf16 out)
# K = 27 passed unpadded (full-extent block dim); Mosaic pads in VMEM.
# ----------------------------------------------------------------------------
def _conv1_kernel(x_ref, w_ref, o_ref):
    acc = jnp.dot(x_ref[...], w_ref[...], preferred_element_type=jnp.float32)
    acc = jnp.where(acc > 0, acc, 0.2 * acc)          # LeakyReLU(0.2)
    o_ref[...] = acc.astype(o_ref.dtype)


def conv1_matmul(p, w, tile_cap=4096):
    m, k = p.shape
    nout = w.shape[1]
    tm = _row_tile(m, tile_cap)
    return pl.pallas_call(
        _conv1_kernel,
        out_shape=jax.ShapeDtypeStruct((m, nout), jnp.bfloat16),
        grid=(m // tm,),
        in_specs=[pl.BlockSpec((tm, k), lambda i: (i, 0)),          # row tile
                  pl.BlockSpec((k, nout), lambda i: (0, 0))],       # resident W
        out_specs=pl.BlockSpec((tm, nout), lambda i: (i, 0)),
        compiler_params=pltpu.CompilerParams(
            dimension_semantics=("parallel",)),
    )(p, w)


# ----------------------------------------------------------------------------
# Kernel 2: conv2 + BN(folded) + LeakyReLU + Flatten + Dropout(eval) +
#           Linear + Sigmoid, fully fused and batch-blocked.
# Grid: (batch_tiles, row_tiles). Per-sample FC partials are accumulated in a
# (BT,1,256) VMEM scratch across the row-tile (reduction) axis; the cross-lane
# reduction, bias add and sigmoid run only on the last reduction step.
# ----------------------------------------------------------------------------
def _conv2_fc_kernel(x_ref, w_ref, scale_ref, shift_ref, fcw_ref, fcb_ref,
                     o_ref, acc_ref):
    r = pl.program_id(1)

    @pl.when(r == 0)
    def _():
        acc_ref[...] = jnp.zeros_like(acc_ref)

    bt, tm2, k2 = x_ref.shape
    nout = w_ref.shape[1]

    # one large MXU matmul per step: M = BT*TM2 rows
    x = x_ref[...].reshape(bt * tm2, k2)
    y = jnp.dot(x, w_ref[...], preferred_element_type=jnp.float32)
    y = y * scale_ref[...] + shift_ref[...]           # folded BatchNorm (eval)
    y = jnp.where(y > 0, y, 0.2 * y)                  # LeakyReLU(0.2)

    # FC partial: per-sample, per-channel (defer the lane reduction)
    fcw = fcw_ref[...].astype(jnp.float32)            # (TM2, 256)
    partial = jnp.sum(y.reshape(bt, tm2, nout) * fcw[None, :, :],
                      axis=1, keepdims=True)          # (BT, 1, 256)
    acc_ref[...] += partial

    @pl.when(r == pl.num_programs(1) - 1)
    def _():
        logit = jnp.sum(acc_ref[...], axis=2, keepdims=True) + fcb_ref[...]
        o_ref[...] = jax.nn.sigmoid(logit)            # written once per tile


def conv2_bn_fc_fused(p2, w2, scale, shift, fcw, fcb, row_cap=1024):
    n, m2, k2 = p2.shape
    nout = w2.shape[1]
    bt, tm2 = _pick_tiles(n, m2, row_cap)
    grid = (n // bt, m2 // tm2)
    out = pl.pallas_call(
        _conv2_fc_kernel,
        out_shape=jax.ShapeDtypeStruct((n, 1, 1), jnp.float32),
        grid=grid,
        in_specs=[
            pl.BlockSpec((bt, tm2, k2), lambda b, r: (b, r, 0)),  # patch rows
            pl.BlockSpec((k2, nout), lambda b, r: (0, 0)),        # resident W2
            pl.BlockSpec((1, nout), lambda b, r: (0, 0)),         # BN scale
            pl.BlockSpec((1, nout), lambda b, r: (0, 0)),         # BN shift
            pl.BlockSpec((tm2, nout), lambda b, r: (r, 0)),       # FC weight rows
            pl.BlockSpec((1, 1, 1), lambda b, r: (0, 0, 0)),      # FC bias
        ],
        out_specs=pl.BlockSpec((bt, 1, 1), lambda b, r: (b, 0, 0)),
        scratch_shapes=[pltpu.VMEM((bt, 1, nout), jnp.float32)],  # FC partials
        compiler_params=pltpu.CompilerParams(
            dimension_semantics=("parallel", "arbitrary")),
    )(p2, w2, scale, shift, fcw, fcb)
    return out.reshape(n, 1)


# ----------------------------------------------------------------------------
# Full Discriminator forward
# ----------------------------------------------------------------------------
def discriminator_forward(x_nchw, params):
    n = x_nchw.shape[0]
    x = jnp.transpose(x_nchw, (0, 2, 3, 1)).astype(jnp.bfloat16)   # NHWC, bf16

    # Conv1 + LeakyReLU(0.2)   (K = 27, unpadded)
    p1, h1, w1 = im2col(x, k=3, stride=2, pad=1)       # (N, H1*W1, 27)
    p1 = p1.reshape(n * h1 * w1, 27)
    y1 = conv1_matmul(p1, params["w1_mat"])            # (N*H1*W1, 128) bf16
    y1 = y1.reshape(n, h1, w1, 128)                    # NHWC

    # Conv2 + BN + LeakyReLU + Flatten + Dropout(eval) + Linear + Sigmoid
    p2, _, _ = im2col(y1, k=3, stride=2, pad=1)        # (N, H2*W2, 1152) bf16
    eps = 1e-5
    scale = params["bn_gamma"] * jax.lax.rsqrt(params["bn_var"] + eps)
    shift = params["bn_beta"] - params["bn_mean"] * scale
    out = conv2_bn_fc_fused(
        p2, params["w2_mat"],
        scale.reshape(1, 256).astype(jnp.float32),
        shift.reshape(1, 256).astype(jnp.float32),
        params["fcw_nhwc"],
        params["fc_b"].reshape(1, 1, 1).astype(jnp.float32))
    return out                                         # (N, 1)


# ----------------------------------------------------------------------------
# Params (PyTorch layouts -> kernel layouts) and pure-JAX reference
# ----------------------------------------------------------------------------
def init_params(key, d_dim):
    assert d_dim % 4 == 0
    h2 = d_dim // 4
    m2 = h2 * h2
    f = 256 * m2
    k1, k2, k3, k4 = jax.random.split(key, 4)
    raw = {
        "w1": jax.random.normal(k1, (128, 3, 3, 3), jnp.float32) * 0.05,  # (O,I,kh,kw)
        "w2": jax.random.normal(k2, (256, 128, 3, 3), jnp.float32) * 0.02,
        "fc_w": jax.random.normal(k3, (1, f), jnp.float32) * 0.01,        # (out, in)
        "fc_b": jax.random.normal(k4, (1,), jnp.float32) * 0.01,
        "bn_gamma": jnp.ones((256,), jnp.float32),
        "bn_beta": jnp.zeros((256,), jnp.float32),
        "bn_mean": jnp.zeros((256,), jnp.float32),
        "bn_var": jnp.ones((256,), jnp.float32),
    }

    w1_mat = conv_weight_to_matrix(raw["w1"]).astype(jnp.bfloat16)      # (27, 128)
    w2_mat = conv_weight_to_matrix(raw["w2"]).astype(jnp.bfloat16)      # (1152, 256)
    # PyTorch flattens NCHW; permute the FC weight rows once to NHWC-flatten
    # order so the fused kernel consumes conv2 output without any transpose.
    fcw_nhwc = (raw["fc_w"].reshape(256, h2, h2).transpose(1, 2, 0)
                .reshape(m2, 256).astype(jnp.bfloat16))                 # (m2, 256)

    params = {
        "w1_mat": w1_mat,
        "w2_mat": w2_mat,
        "bn_gamma": raw["bn_gamma"], "bn_beta": raw["bn_beta"],
        "bn_mean": raw["bn_mean"], "bn_var": raw["bn_var"],
        "fcw_nhwc": fcw_nhwc,
        "fc_b": raw["fc_b"],
    }
    return params, raw


def reference_forward(x_nchw, raw):
    dn = ("NCHW", "OIHW", "NCHW")
    y1 = jax.lax.conv_general_dilated(x_nchw, raw["w1"], (2, 2),
                                      ((1, 1), (1, 1)), dimension_numbers=dn)
    y1 = jnp.where(y1 > 0, y1, 0.2 * y1)
    y2 = jax.lax.conv_general_dilated(y1, raw["w2"], (2, 2),
                                      ((1, 1), (1, 1)), dimension_numbers=dn)
    eps = 1e-5
    scale = raw["bn_gamma"] * jax.lax.rsqrt(raw["bn_var"] + eps)
    shift = raw["bn_beta"] - raw["bn_mean"] * scale
    y2 = y2 * scale[None, :, None, None] + shift[None, :, None, None]
    y2 = jnp.where(y2 > 0, y2, 0.2 * y2)
    flat = y2.reshape(y2.shape[0], -1)                 # NCHW flatten (PyTorch)
    logit = flat @ raw["fc_w"].T + raw["fc_b"]
    return jax.nn.sigmoid(logit)


if __name__ == "__main__":
    d_dim = 16
    batch = 2
    key = jax.random.PRNGKey(0)
    kx, kp = jax.random.split(key)
    x = jax.random.normal(kx, (batch, 3, d_dim, d_dim), jnp.float32)   # NCHW
    params, raw = init_params(kp, d_dim)

    out = jax.jit(discriminator_forward)(x, params)
    out = jax.block_until_ready(out)

    assert out.shape == (batch, 1)
    assert bool(jnp.all(jnp.isfinite(out)))
    assert bool(jnp.all((out >= 0.0) & (out <= 1.0)))

    ref = reference_forward(x, raw)                    # full-f32 reference
    assert bool(jnp.allclose(out, ref, atol=5e-3)), (out, ref)
    print("KERNEL_OK")
</pallas_src>

<mosaic_0001>
module attributes {stable_mosaic.version = 11 : i64} {
  func.func @_conv1_kernel(%arg0: i32, %arg1: memref<128x27xbf16, #tpu.memory_space<vmem>>, %arg2: memref<27x128xbf16, #tpu.memory_space<vmem>>, %arg3: memref<128x128xbf16, #tpu.memory_space<vmem>>) attributes {dimension_semantics = [#tpu.dimension_semantics<parallel>], iteration_bounds = array<i64: 1>, scalar_prefetch = 0 : i64, scratch_operands = 0 : i64, tpu.core_type = #tpu.core_type<tc>, window_params = [{transform_indices = @transform_0, window_bounds = array<i64: 128, 27>}, {pipeline_mode = #tpu.pipeline_mode<synchronous>, transform_indices = @transform_1, window_bounds = array<i64: 27, 128>}, {transform_indices = @transform_2, window_bounds = array<i64: 128, 128>}]} {
    %c0 = arith.constant 0 : index
    %c0_0 = arith.constant 0 : index
    %0 = vector.load %arg1[%c0, %c0_0] : memref<128x27xbf16, #tpu.memory_space<vmem>>, vector<128x27xbf16>
    %c0_1 = arith.constant 0 : index
    %c0_2 = arith.constant 0 : index
    %1 = vector.load %arg2[%c0_1, %c0_2] : memref<27x128xbf16, #tpu.memory_space<vmem>>, vector<27x128xbf16>
    %cst = arith.constant dense<0.000000e+00> : vector<128x128xf32>
    %2 = tpu.matmul %0, %1, %cst {dimension_numbers = #tpu.dot_dimension_numbers<[1], [0], [0], [1], [0, 0, 1, 1], [], []>} : vector<128x27xbf16>, vector<27x128xbf16>, vector<128x128xf32> -> vector<128x128xf32>
    %cst_3 = arith.constant 0.000000e+00 : f32
    %3 = vector.broadcast %cst_3 : f32 to vector<128x128xf32>
    %4 = arith.cmpf ogt, %2, %3 : vector<128x128xf32>
    %cst_4 = arith.constant 2.000000e-01 : f32
    %5 = vector.broadcast %cst_4 : f32 to vector<128x128xf32>
    %6 = arith.mulf %5, %2 : vector<128x128xf32>
    %7 = arith.select %4, %2, %6 : vector<128x128xi1>, vector<128x128xf32>
    %8 = arith.truncf %7 : vector<128x128xf32> to vector<128x128xbf16>
    %c0_5 = arith.constant 0 : index
    %c0_6 = arith.constant 0 : index
    %9 = vector.load %arg3[%c0_5, %c0_6] : memref<128x128xbf16, #tpu.memory_space<vmem>>, vector<128x128xbf16>
    tpu.vector_store %arg3[%c0_5, %c0_6], %8 {strides = array<i32>} : memref<128x128xbf16, #tpu.memory_space<vmem>>, vector<128x128xbf16>,
    return
  }
  func.func @transform_0(%arg0: i32) -> (i32, i32) {
    %c0_i32 = arith.constant 0 : i32
    %c0_i32_0 = arith.constant 0 : i32
    return %arg0, %c0_i32 : i32, i32
  }
  func.func @transform_1(%arg0: i32) -> (i32, i32) {
    %c0_i32 = arith.constant 0 : i32
    %c0_i32_0 = arith.constant 0 : i32
    %c0_i32_1 = arith.constant 0 : i32
    return %c0_i32, %c0_i32_0 : i32, i32
  }
  func.func @transform_2(%arg0: i32) -> (i32, i32) {
    %c0_i32 = arith.constant 0 : i32
    %c0_i32_0 = arith.constant 0 : i32
    return %arg0, %c0_i32 : i32, i32
  }
}

module attributes {stable_mosaic.version = 11 : i64} {
  func.func @_conv2_fc_kernel(%arg0: i32, %arg1: i32, %arg2: memref<2x16x1152xbf16, #tpu.memory_space<vmem>>, %arg3: memref<1152x256xbf16, #tpu.memory_space<vmem>>, %arg4: memref<1x256xf32, #tpu.memory_space<vmem>>, %arg5: memref<1x256xf32, #tpu.memory_space<vmem>>, %arg6: memref<16x256xbf16, #tpu.memory_space<vmem>>, %arg7: memref<1x1x1xf32, #tpu.memory_space<vmem>>, %arg8: memref<2x1x1xf32, #tpu.memory_space<vmem>>, %arg9: memref<2x1x256xf32, #tpu.memory_space<vmem>>) attributes {dimension_semantics = [#tpu.dimension_semantics<parallel>, #tpu.dimension_semantics<arbitrary>], iteration_bounds = array<i64: 1, 1>, scalar_prefetch = 0 : i64, scratch_operands = 1 : i64, tpu.core_type = #tpu.core_type<tc>, window_params = [{transform_indices = @transform_0, window_bounds = array<i64: 2, 16, 1152>}, {pipeline_mode = #tpu.pipeline_mode<synchronous>, transform_indices = @transform_1, window_bounds = array<i64: 1152, 256>}, {pipeline_mode = #tpu.pipeline_mode<synchronous>, transform_indices = @transform_2, window_bounds = array<i64: 1, 256>}, {pipeline_mode = #tpu.pipeline_mode<synchronous>, transform_indices = @transform_3, window_bounds = array<i64: 1, 256>}, {transform_indices = @transform_4, window_bounds = array<i64: 16, 256>}, {pipeline_mode = #tpu.pipeline_mode<synchronous>, transform_indices = @transform_5, window_bounds = array<i64: 1, 1, 1>}, {transform_indices = @transform_6, window_bounds = array<i64: 2, 1, 1>}]} {
    %c0_i32 = arith.constant 0 : i32
    %0 = arith.cmpi eq, %arg1, %c0_i32 : i32
    %1 = arith.extui %0 : i1 to i32
    %c0_i32_0 = arith.constant 0 : i32
    %2 = arith.cmpi ne, %1, %c0_i32_0 : i32
    scf.if %2 {
      %cst_22 = arith.constant 0.000000e+00 : f32
      %32 = vector.broadcast %cst_22 : f32 to vector<2x1x256xf32>
      %c0_23 = arith.constant 0 : index
      %c0_24 = arith.constant 0 : index
      %c0_25 = arith.constant 0 : index
      %33 = vector.load %arg9[%c0_23, %c0_24, %c0_25] : memref<2x1x256xf32, #tpu.memory_space<vmem>>, vector<2x1x256xf32>
      tpu.vector_store %arg9[%c0_23, %c0_24, %c0_25], %32 {strides = array<i32>} : memref<2x1x256xf32, #tpu.memory_space<vmem>>, vector<2x1x256xf32>,
    } else {
    }
    %c0 = arith.constant 0 : index
    %c0_1 = arith.constant 0 : index
    %c0_2 = arith.constant 0 : index
    %3 = vector.load %arg2[%c0, %c0_1, %c0_2] : memref<2x16x1152xbf16, #tpu.memory_space<vmem>>, vector<2x16x1152xbf16>
    %4 = vector.shape_cast %3 : vector<2x16x1152xbf16> to vector<32x1152xbf16>
    %c0_3 = arith.constant 0 : index
    %c0_4 = arith.constant 0 : index
    %5 = vector.load %arg3[%c0_3, %c0_4] : memref<1152x256xbf16, #tpu.memory_space<vmem>>, vector<1152x256xbf16>
    %cst = arith.constant dense<0.000000e+00> : vector<32x256xf32>
    %6 = tpu.matmul %4, %5, %cst {dimension_numbers = #tpu.dot_dimension_numbers<[1], [0], [0], [1], [0, 0, 1, 1], [], []>} : vector<32x1152xbf16>, vector<1152x256xbf16>, vector<32x256xf32> -> vector<32x256xf32>
    %c0_5 = arith.constant 0 : index
    %c0_6 = arith.constant 0 : index
    %7 = vector.load %arg4[%c0_5, %c0_6] : memref<1x256xf32, #tpu.memory_space<vmem>>, vector<1x256xf32>
    %8 = vector.broadcast %7 : vector<1x256xf32> to vector<32x256xf32>
    %9 = arith.mulf %6, %8 : vector<32x256xf32>
    %c0_7 = arith.constant 0 : index
    %c0_8 = arith.constant 0 : index
    %10 = vector.load %arg5[%c0_7, %c0_8] : memref<1x256xf32, #tpu.memory_space<vmem>>, vector<1x256xf32>
    %11 = vector.broadcast %10 : vector<1x256xf32> to vector<32x256xf32>
    %12 = arith.addf %9, %11 : vector<32x256xf32>
    %cst_9 = arith.constant 0.000000e+00 : f32
    %13 = vector.broadcast %cst_9 : f32 to vector<32x256xf32>
    %14 = arith.cmpf ogt, %12, %13 : vector<32x256xf32>
    %cst_10 = arith.constant 2.000000e-01 : f32
    %15 = vector.broadcast %cst_10 : f32 to vector<32x256xf32>
    %16 = arith.mulf %15, %12 : vector<32x256xf32>
    %17 = arith.select %14, %12, %16 : vector<32x256xi1>, vector<32x256xf32>
    %c0_11 = arith.constant 0 : index
    %c0_12 = arith.constant 0 : index
    %18 = vector.load %arg6[%c0_11, %c0_12] : memref<16x256xbf16, #tpu.memory_space<vmem>>, vector<16x256xbf16>
    %19 = arith.extf %18 : vector<16x256xbf16> to vector<16x256xf32>
    %20 = vector.shape_cast %17 : vector<32x256xf32> to vector<2x16x256xf32>
    %21 = vector.shape_cast %19 : vector<16x256xf32> to vector<1x16x256xf32>
    %22 = vector.broadcast %21 : vector<1x16x256xf32> to vector<2x16x256xf32>
    %23 = arith.mulf %20, %22 : vector<2x16x256xf32>
    %cst_13 = arith.constant dense<0.000000e+00> : vector<2x256xf32>
    %24 = vector.multi_reduction <add>, %23, %cst_13 [1] : vector<2x16x256xf32> to vector<2x256xf32>
    %25 = vector.shape_cast %24 : vector<2x256xf32> to vector<2x1x256xf32>
    %c0_14 = arith.constant 0 : index
    %c0_15 = arith.constant 0 : index
    %c0_16 = arith.constant 0 : index
    %26 = vector.load %arg9[%c0_14, %c0_15, %c0_16] : memref<2x1x256xf32, #tpu.memory_space<vmem>>, vector<2x1x256xf32>
    %27 = arith.addf %26, %25 : vector<2x1x256xf32>
    %c0_17 = arith.constant 0 : index
    %c0_18 = arith.constant 0 : index
    %c0_19 = arith.constant 0 : index
    %28 = vector.load %arg9[%c0_17, %c0_18, %c0_19] : memref<2x1x256xf32, #tpu.memory_space<vmem>>, vector<2x1x256xf32>
    tpu.vector_store %arg9[%c0_17, %c0_18, %c0_19], %27 {strides = array<i32>} : memref<2x1x256xf32, #tpu.memory_space<vmem>>, vector<2x1x256xf32>,
    %c0_i32_20 = arith.constant 0 : i32
    %29 = arith.cmpi eq, %arg1, %c0_i32_20 : i32
    %30 = arith.extui %29 : i1 to i32
    %c0_i32_21 = arith.constant 0 : i32
    %31 = arith.cmpi ne, %30, %c0_i32_21 : i32
    scf.if %31 {
      %c0_22 = arith.constant 0 : index
      %c0_23 = arith.constant 0 : index
      %c0_24 = arith.constant 0 : index
      %32 = vector.load %arg9[%c0_22, %c0_23, %c0_24] : memref<2x1x256xf32, #tpu.memory_space<vmem>>, vector<2x1x256xf32>
      %cst_25 = arith.constant dense<0.000000e+00> : vector<2x1xf32>
      %33 = vector.multi_reduction <add>, %32, %cst_25 [2] : vector<2x1x256xf32> to vector<2x1xf32>
      %34 = vector.shape_cast %33 : vector<2x1xf32> to vector<2x1x1xf32>
      %c0_26 = arith.constant 0 : index
      %c0_27 = arith.constant 0 : index
      %c0_28 = arith.constant 0 : index
      %35 = vector.load %arg7[%c0_26, %c0_27, %c0_28] : memref<1x1x1xf32, #tpu.memory_space<vmem>>, vector<1x1x1xf32>
      %36 = vector.broadcast %35 : vector<1x1x1xf32> to vector<2x1x1xf32>
      %37 = arith.addf %34, %36 : vector<2x1x1xf32>
      %38 = arith.negf %37 : vector<2x1x1xf32>
      %39 = math.exp %38 : vector<2x1x1xf32>
      %cst_29 = arith.constant 1.000000e+00 : f32
      %40 = vector.broadcast %cst_29 : f32 to vector<2x1x1xf32>
      %41 = arith.addf %40, %39 : vector<2x1x1xf32>
      %42 = arith.divf %40, %41 : vector<2x1x1xf32>
      %c0_30 = arith.constant 0 : index
      %c0_31 = arith.constant 0 : index
      %c0_32 = arith.constant 0 : index
      %43 = vector.load %arg8[%c0_30, %c0_31, %c0_32] : memref<2x1x1xf32, #tpu.memory_space<vmem>>, vector<2x1x1xf32>
      tpu.vector_store %arg8[%c0_30, %c0_31, %c0_32], %42 {strides = array<i32>} : memref<2x1x1xf32, #tpu.memory_space<vmem>>, vector<2x1x1xf32>,
    } else {
    }
    return
  }
  func.func @transform_0(%arg0: i32, %arg1: i32) -> (i32, i32, i32) {
    %c0_i32 = arith.constant 0 : i32
    %c0_i32_0 = arith.constant 0 : i32
    return %arg0, %arg1, %c0_i32 : i32, i32, i32
  }
  func.func @transform_1(%arg0: i32, %arg1: i32) -> (i32, i32) {
    %c0_i32 = arith.constant 0 : i32
    %c0_i32_0 = arith.constant 0 : i32
    %c0_i32_1 = arith.constant 0 : i32
    return %c0_i32, %c0_i32_0 : i32, i32
  }
  func.func @transform_2(%arg0: i32, %arg1: i32) -> (i32, i32) {
    %c0_i32 = arith.constant 0 : i32
    %c0_i32_0 = arith.constant 0 : i32
    %c0_i32_1 = arith.constant 0 : i32
    return %c0_i32, %c0_i32_0 : i32, i32
  }
  func.func @transform_3(%arg0: i32, %arg1: i32) -> (i32, i32) {
    %c0_i32 = arith.constant 0 : i32
    %c0_i32_0 = arith.constant 0 : i32
    %c0_i32_1 = arith.constant 0 : i32
    return %c0_i32, %c0_i32_0 : i32, i32
  }
  func.func @transform_4(%arg0: i32, %arg1: i32) -> (i32, i32) {
    %c0_i32 = arith.constant 0 : i32
    %c0_i32_0 = arith.constant 0 : i32
    return %arg1, %c0_i32 : i32, i32
  }
  func.func @transform_5(%arg0: i32, %arg1: i32) -> (i32, i32, i32) {
    %c0_i32 = arith.constant 0 : i32
    %c0_i32_0 = arith.constant 0 : i32
    %c0_i32_1 = arith.constant 0 : i32
    %c0_i32_2 = arith.constant 0 : i32
    return %c0_i32, %c0_i32_0, %c0_i32_1 : i32, i32, i32
  }
  func.func @transform_6(%arg0: i32, %arg1: i32) -> (i32, i32, i32) {
    %c0_i32 = arith.constant 0 : i32
    %c0_i32_0 = arith.constant 0 : i32
    %c0_i32_1 = arith.constant 0 : i32
    return %arg0, %c0_i32, %c0_i32_0 : i32, i32, i32
  }
}

</mosaic_0001>

<bundles_post_ra>
// kernel: discriminator_forward.2
= control target key start
LH: loop header
LB: loop body
LE: loop exit
PB: predicated region body
PF: predicated region fallthrough
CT: control target
= control target key end

     0   :  { %vm108_vm0 = vcmask 1044480   ;;  %vm109_vm1 = vcmask 1045504   ;;  %v360_v2 = vmov 65535   ;;  %vm83_vm2 = vcmask 220160   ;;  %s441_s1 = inlined_call_operand.vmem [shape: bf16[27,128], index: 1, kind: input, shape index: {}]   ;;  %s442_s0 = inlined_call_operand.vmem [shape: bf16[128,27], index: 0, kind: input, shape index: {}]   ;;  %s443_s2 = inlined_call_operand.vmem [shape: bf16[128,128], index: 2, kind: output, shape index: {}]  }
   0x1   :  { %v286_v0 = vld [vmem:[%s441_s1 + $0x8] sm:$0xf]  ;;  %v305_v1 = vld [vmem:[%s441_s1 + $0x8] sm:$0x30]  ;;  %v110_v3 = vsel %vm108_vm0, 4294967295, %v360_v2  ;;  %v304_v7 = vld [vmem:[%s441_s1] sm:$0xff] }
   0x2   :  { %v287_v4 = vor.u32 %v305_v1, %v286_v0  ;;  %v111_v5 = vsel %vm109_vm1, %v110_v3, 0  ;;  %v296_v8 = vld [vmem:[%s442_s0] sm:$0xff]  ;;  %v298_v9 = vld [vmem:[%s442_s0 + $0x10] sm:$0xff]  ;;  %v297_v12 = vld [vmem:[%s442_s0 + $0x8] sm:$0xff] }
   0x3   :  { %v300_v10 = vld [vmem:[%s442_s0 + $0x20] sm:$0xff]  ;;  %v302_v11 = vld [vmem:[%s442_s0 + $0x30] sm:$0xff]  ;;  %v299_v13 = vld [vmem:[%s442_s0 + $0x18] sm:$0xff] }
   0x4   :  { %v113_v6 = vand.u32 %v287_v4, %v111_v5  ;;  %v301_v14 = vld [vmem:[%s442_s0 + $0x28] sm:$0xff]  ;;  %v303_v15 = vld [vmem:[%s442_s0 + $0x38] sm:$0xff] }
   0x6   :  { %121 = vmatpush.bf16.msra.mxu0 %v113_v6  ;;  %353 = vmatpush.bf16.msra.mxu1 %v113_v6 }
   0x7   :  { %354 = vmatpush.bf16.msra.mxu2 %v113_v6  ;;  %355 = vmatpush.bf16.msra.mxu3 %v113_v6 }
   0xa   :  { %122 = vmatpush.bf16.msra.mxu0 %v304_v7  ;;  %356 = vmatpush.bf16.msra.mxu1 %v304_v7 }
   0xb   :  { %357 = vmatpush.bf16.msra.mxu2 %v304_v7  ;;  %358 = vmatpush.bf16.msra.mxu3 %v304_v7 }
   0xd   :  { %288 = vmatmul.msk.bf16.vlgmr.msra.gmra.mxu0 %vm83_vm2, %v296_v8  ;;  %290 = vmatmul.msk.bf16.vlgmr.msra.gmra.mxu1 %vm83_vm2, %v298_v9 }
   0xe   :  { %292 = vmatmul.msk.bf16.vlgmr.msra.gmra.mxu2 %vm83_vm2, %v300_v10  ;;  %294 = vmatmul.msk.bf16.vlgmr.msra.gmra.mxu3 %vm83_vm2, %v302_v11 }
  0x1d   :  { %289 = vmatmul.msk.bf16.gmra.mxu0 %vm83_vm2, %v297_v12  ;;  %291 = vmatmul.msk.bf16.gmra.mxu1 %vm83_vm2, %v299_v13 }
  0x1e   :  { %293 = vmatmul.msk.bf16.gmra.mxu2 %vm83_vm2, %v301_v14  ;;  %295 = vmatmul.msk.bf16.gmra.mxu3 %vm83_vm2, %v303_v15 }
  0x8a   :  { %v124_v16 = vpop.f32.mrf.mxu0  ;;  %v134_v17 = vpop.f32.mrf.mxu1 }
  0x8b   :  { %v180_v18 = vmul.f32 0.2, %v124_v16  ;;  %v184_v19 = vmul.f32 0.2, %v134_v17  ;;  %vm164_vm3 = vcmp.gt.f32.partialorder %v124_v16, 0.0  ;;  %vm168_vm4 = vcmp.gt.f32.partialorder %v134_v17, 0.0 }
  0x8d   :  { %v196_v26 = vsel %vm164_vm3, %v124_v16, %v180_v18  ;;  %v200_v27 = vsel %vm168_vm4, %v134_v17, %v184_v19 }
  0x91   :  { %v144_v20 = vpop.f32.mrf.mxu2  ;;  %v154_v21 = vpop.f32.mrf.mxu3 }
  0x92   :  { %v126_v22 = vpop.f32.mrf.mxu0  ;;  %v136_v23 = vpop.f32.mrf.mxu1  ;;  %v188_v32 = vmul.f32 0.2, %v144_v20  ;;  %v192_v33 = vmul.f32 0.2, %v154_v21  ;;  %vm172_vm7 = vcmp.gt.f32.partialorder %v144_v20, 0.0  ;;  %vm176_vm8 = vcmp.gt.f32.partialorder %v154_v21, 0.0 }
  0x93   :  { %vm165_vm5 = vcmp.gt.f32.partialorder %v126_v22, 0.0  ;;  %v181_v24 = vmul.f32 0.2, %v126_v22  ;;  %vm169_vm6 = vcmp.gt.f32.partialorder %v136_v23, 0.0  ;;  %v185_v25 = vmul.f32 0.2, %v136_v23 }
  0x94   :  { %v204_v40 = vsel %vm172_vm7, %v144_v20, %v188_v32  ;;  %v208_v41 = vsel %vm176_vm8, %v154_v21, %v192_v33 }
  0x95   :  { %v197_v28 = vsel %vm165_vm5, %v126_v22, %v181_v24  ;;  %v201_v29 = vsel %vm169_vm6, %v136_v23, %v185_v25 }
  0x96   :  { %v309_v30 = vpack.c.bf16 %v197_v28, %v196_v26  ;;  %v319_v31 = vpack.c.bf16 %v201_v29, %v200_v27 }
  0x98   :  { %310 = vst [vmem:[%s443_s2] sm:$0xff] %v309_v30  }
  0x99   :  { %347 = vst [vmem:[%s443_s2 + $0x10] sm:$0xff] %v319_v31   ;;  %v146_v34 = vpop.f32.mrf.mxu2  ;;  %v156_v35 = vpop.f32.mrf.mxu3 }
  0x9a   :  { %vm173_vm9 = vcmp.gt.f32.partialorder %v146_v34, 0.0  ;;  %v189_v36 = vmul.f32 0.2, %v146_v34  ;;  %vm177_vm10 = vcmp.gt.f32.partialorder %v156_v35, 0.0  ;;  %v193_v37 = vmul.f32 0.2, %v156_v35  ;;  %v129_v38 = vpop.f32.mrf.mxu0  ;;  %v139_v39 = vpop.f32.mrf.mxu1 }
  0x9b   :  { %v182_v46 = vmul.f32 0.2, %v129_v38  ;;  %v186_v47 = vmul.f32 0.2, %v139_v39  ;;  %vm166_vm11 = vcmp.gt.f32.partialorder %v129_v38, 0.0  ;;  %vm170_vm12 = vcmp.gt.f32.partialorder %v139_v39, 0.0 }
  0x9c   :  { %v205_v42 = vsel %vm173_vm9, %v146_v34, %v189_v36  ;;  %v209_v43 = vsel %vm177_vm10, %v156_v35, %v193_v37 }
  0x9d   :  { %v329_v44 = vpack.c.bf16 %v205_v42, %v204_v40  ;;  %v339_v45 = vpack.c.bf16 %v209_v43, %v208_v41  ;;  %v198_v54 = vsel %vm166_vm11, %v129_v38, %v182_v46  ;;  %v202_v55 = vsel %vm170_vm12, %v139_v39, %v186_v47 }
  0x9f   :  { %349 = vst [vmem:[%s443_s2 + $0x20] sm:$0xff] %v329_v44  }
  0xa0   :  { %351 = vst [vmem:[%s443_s2 + $0x30] sm:$0xff] %v339_v45  }
  0xa1   :  { %v149_v48 = vpop.f32.mrf.mxu2  ;;  %v159_v49 = vpop.f32.mrf.mxu3 }
  0xa2   :  { %v131_v50 = vpop.f32.mrf.mxu0  ;;  %v141_v51 = vpop.f32.mrf.mxu1  ;;  %v190_v60 = vmul.f32 0.2, %v149_v48  ;;  %v194_v61 = vmul.f32 0.2, %v159_v49  ;;  %vm174_vm15 = vcmp.gt.f32.partialorder %v149_v48, 0.0  ;;  %vm178_vm0 = vcmp.gt.f32.partialorder %v159_v49, 0.0 }
  0xa3   :  { %vm167_vm13 = vcmp.gt.f32.partialorder %v131_v50, 0.0  ;;  %v183_v52 = vmul.f32 0.2, %v131_v50  ;;  %vm171_vm14 = vcmp.gt.f32.partialorder %v141_v51, 0.0  ;;  %v187_v53 = vmul.f32 0.2, %v141_v51 }
  0xa4   :  { %v206_v2 = vsel %vm174_vm15, %v149_v48, %v190_v60  ;;  %v210_v3 = vsel %vm178_vm0, %v159_v49, %v194_v61 }
  0xa5   :  { %v199_v56 = vsel %vm167_vm13, %v131_v50, %v183_v52  ;;  %v203_v57 = vsel %vm171_vm14, %v141_v51, %v187_v53 }
  0xa6   :  { %v314_v58 = vpack.c.bf16 %v199_v56, %v198_v54  ;;  %v324_v59 = vpack.c.bf16 %v203_v57, %v202_v55 }
  0xa8   :  { %346 = vst [vmem:[%s443_s2 + $0x8] sm:$0xff] %v314_v58  }
  0xa9   :  { %348 = vst [vmem:[%s443_s2 + $0x18] sm:$0xff] %v324_v59   ;;  %v151_v62 = vpop.f32.mrf.mxu2  ;;  %v161_v63 = vpop.f32.mrf.mxu3 }
  0xaa   :  { %vm175_vm1 = vcmp.gt.f32.partialorder %v151_v62, 0.0  ;;  %v191_v0 = vmul.f32 0.2, %v151_v62  ;;  %vm179_vm2 = vcmp.gt.f32.partialorder %v161_v63, 0.0  ;;  %v195_v1 = vmul.f32 0.2, %v161_v63 }
  0xac   :  { %v207_v4 = vsel %vm175_vm1, %v151_v62, %v191_v0  ;;  %v211_v5 = vsel %vm179_vm2, %v161_v63, %v195_v1 }
  0xad   :  { %v334_v6 = vpack.c.bf16 %v207_v4, %v206_v2  ;;  %v344_v7 = vpack.c.bf16 %v211_v5, %v210_v3 }
  0xaf   :  { %350 = vst [vmem:[%s443_s2 + $0x28] sm:$0xff] %v334_v6  }
  0xb0   :  { %352 = vst [vmem:[%s443_s2 + $0x38] sm:$0xff] %v344_v7  }

// kernel: discriminator_forward.3
= control target key start
LH: loop header
LB: loop body
LE: loop exit
PB: predicated region body
PF: predicated region fallthrough
CT: control target
= control target key end

     0   :  { %vm1455_vm9 = vcmask 1040384   ;;  %vm1534_vm12 = vcmask 0   ;;  %s3523_s1 = inlined_call_operand.vmem [shape: bf16[1152,256], index: 1, kind: input, shape index: {}]   ;;  %s3524_s0 = inlined_call_operand.vmem [shape: bf16[2,16,1152], index: 0, kind: input, shape index: {}]   ;;  %s3525_s2 = inlined_call_operand.vmem [shape: f32[1,256], index: 2, kind: input, shape index: {}]   ;;  %s3526_s3 = inlined_call_operand.vmem [shape: f32[1,256], index: 3, kind: input, shape index: {}]   ;;  %s3527_s4 = inlined_call_operand.vmem [shape: bf16[16,256], index: 4, kind: input, shape index: {}]   ;;  %s3528_s5 = inlined_call_operand.<no memory space> [shape: f32[1,1,1], index: 5, kind: input, shape index: {}]   ;;  %s3529_s6 = inlined_call_operand.vmem [shape: f32[2,1,1], index: 6, kind: output, shape index: {}]  }
   0x1   :  { %v1671_v0 = vld [vmem:[%s3523_s1 + $0x70] sm:$0xf]  ;;  %v2224_v1 = vld [vmem:[%s3523_s1 + $0x74] sm:$0xf0]  ;;  %v1663_v11 = vld [vmem:[%s3523_s1 + $0x60] sm:$0xf] }
   0x2   :  { %v1735_v2 = vld [vmem:[%s3523_s1 + $0xf0] sm:$0xf]  ;;  %v1672_v3 = vor.u32 %v2224_v1, %v1671_v0  ;;  %v2240_v4 = vld [vmem:[%s3523_s1 + $0xf4] sm:$0xf0]  ;;  %v2222_v13 = vld [vmem:[%s3523_s1 + $0x64] sm:$0xf0] }
   0x3   :  { %v1799_v5 = vld [vmem:[%s3523_s1 + $0x170] sm:$0xf]  ;;  %v2256_v6 = vld [vmem:[%s3523_s1 + $0x174] sm:$0xf0]  ;;  %v1736_v7 = vor.u32 %v2240_v4, %v1735_v2  ;;  %v1727_v14 = vld [vmem:[%s3523_s1 + $0xe0] sm:$0xf]  ;;  %v1664_v16 = vor.u32 %v2222_v13, %v1663_v11 }
   0x4   :  { %v1800_v8 = vor.u32 %v2256_v6, %v1799_v5  ;;  %v1863_v9 = vld [vmem:[%s3523_s1 + $0x1f0] sm:$0xf]  ;;  %v2272_v10 = vld [vmem:[%s3523_s1 + $0x1f4] sm:$0xf0]  ;;  %1011 = vmatpush.bf16.msra.mxu0 %v1672_v3  ;;  %v2238_v15 = vld [vmem:[%s3523_s1 + $0xe4] sm:$0xf0] }
   0x5   :  { %v1864_v12 = vor.u32 %v2272_v10, %v1863_v9  ;;  %1030 = vmatpush.bf16.msra.mxu1 %v1736_v7  ;;  %v1728_v17 = vor.u32 %v2238_v15, %v1727_v14  ;;  %v1791_v18 = vld [vmem:[%s3523_s1 + $0x160] sm:$0xf]  ;;  %v2254_v19 = vld [vmem:[%s3523_s1 + $0x164] sm:$0xf0]  ;;  %v1655_v23 = vld [vmem:[%s3523_s1 + $0x50] sm:$0xf] }
   0x6   :  { %1049 = vmatpush.bf16.msra.mxu2 %v1800_v8  ;;  %v1855_v20 = vld [vmem:[%s3523_s1 + $0x1e0] sm:$0xf]  ;;  %v1792_v21 = vor.u32 %v2254_v19, %v1791_v18  ;;  %v2270_v22 = vld [vmem:[%s3523_s1 + $0x1e4] sm:$0xf0]  ;;  %v2220_v24 = vld [vmem:[%s3523_s1 + $0x54] sm:$0xf0] }
   0x7   :  { %1068 = vmatpush.bf16.msra.mxu3 %v1864_v12  ;;  %v1856_v25 = vor.u32 %v2270_v22, %v1855_v20  ;;  %v1719_v26 = vld [vmem:[%s3523_s1 + $0xd0] sm:$0xf]  ;;  %v2236_v27 = vld [vmem:[%s3523_s1 + $0xd4] sm:$0xf0]  ;;  %v1656_v29 = vor.u32 %v2220_v24, %v1655_v23  ;;  %v1647_v35 = vld [vmem:[%s3523_s1 + $0x40] sm:$0xf] }
   0x8   :  { %v1783_v28 = vld [vmem:[%s3523_s1 + $0x150] sm:$0xf]  ;;  %1012 = vmatpush.bf16.msra.mxu0 %v1664_v16  ;;  %v2252_v30 = vld [vmem:[%s3523_s1 + $0x154] sm:$0xf0]  ;;  %v1720_v33 = vor.u32 %v2236_v27, %v1719_v26  ;;  %v2218_v36 = vld [vmem:[%s3523_s1 + $0x44] sm:$0xf0] }
   0x9   :  { %v1847_v31 = vld [vmem:[%s3523_s1 + $0x1d0] sm:$0xf]  ;;  %v2268_v32 = vld [vmem:[%s3523_s1 + $0x1d4] sm:$0xf0]  ;;  %1031 = vmatpush.bf16.msra.mxu1 %v1728_v17  ;;  %v1784_v34 = vor.u32 %v2252_v30, %v1783_v28  ;;  %v1711_v37 = vld [vmem:[%s3523_s1 + $0xc0] sm:$0xf]  ;;  %v1648_v44 = vor.u32 %v2218_v36, %v1647_v35 }
   0xa   :  { %1050 = vmatpush.bf16.msra.mxu2 %v1792_v21  ;;  %v1848_v38 = vor.u32 %v2268_v32, %v1847_v31  ;;  %v2234_v39 = vld [vmem:[%s3523_s1 + $0xc4] sm:$0xf0]  ;;  %v1775_v40 = vld [vmem:[%s3523_s1 + $0x140] sm:$0xf]  ;;  %v1639_v47 = vld [vmem:[%s3523_s1 + $0x30] sm:$0xf] }
   0xb   :  { %1069 = vmatpush.bf16.msra.mxu3 %v1856_v25  ;;  %v2250_v41 = vld [vmem:[%s3523_s1 + $0x144] sm:$0xf0]  ;;  %v1839_v42 = vld [vmem:[%s3523_s1 + $0x1c0] sm:$0xf]  ;;  %v1712_v45 = vor.u32 %v2234_v39, %v1711_v37  ;;  %v2216_v48 = vld [vmem:[%s3523_s1 + $0x34] sm:$0xf0] }
   0xc   :  { %v2266_v43 = vld [vmem:[%s3523_s1 + $0x1c4] sm:$0xf0]  ;;  %1013 = vmatpush.bf16.msra.mxu0 %v1656_v29  ;;  %v1776_v46 = vor.u32 %v2250_v41, %v1775_v40  ;;  %v1703_v49 = vld [vmem:[%s3523_s1 + $0xb0] sm:$0xf]  ;;  %v2232_v51 = vld [vmem:[%s3523_s1 + $0xb4] sm:$0xf0]  ;;  %v1640_v56 = vor.u32 %v2216_v48, %v1639_v47 }
   0xd   :  { %1032 = vmatpush.bf16.msra.mxu1 %v1720_v33  ;;  %v1840_v50 = vor.u32 %v2266_v43, %v1839_v42  ;;  %v1767_v52 = vld [vmem:[%s3523_s1 + $0x130] sm:$0xf]  ;;  %v2248_v53 = vld [vmem:[%s3523_s1 + $0x134] sm:$0xf0]  ;;  %v1704_v57 = vor.u32 %v2232_v51, %v1703_v49  ;;  %v1631_v59 = vld [vmem:[%s3523_s1 + $0x20] sm:$0xf] }
   0xe   :  { %1051 = vmatpush.bf16.msra.mxu2 %v1784_v34  ;;  %v1831_v54 = vld [vmem:[%s3523_s1 + $0x1b0] sm:$0xf]  ;;  %v2264_v55 = vld [vmem:[%s3523_s1 + $0x1b4] sm:$0xf0]  ;;  %v1768_v58 = vor.u32 %v2248_v53, %v1767_v52  ;;  %v2214_v60 = vld [vmem:[%s3523_s1 + $0x24] sm:$0xf0] }
   0xf   :  { %1070 = vmatpush.bf16.msra.mxu3 %v1848_v38  ;;  %v1695_v61 = vld [vmem:[%s3523_s1 + $0xa0] sm:$0xf]  ;;  %v1832_v62 = vor.u32 %v2264_v55, %v1831_v54  ;;  %v2230_v63 = vld [vmem:[%s3523_s1 + $0xa4] sm:$0xf0]  ;;  %v1632_v4 = vor.u32 %v2214_v60, %v1631_v59  ;;  %v1623_v7 = vld [vmem:[%s3523_s1 + $0x10] sm:$0xf] }
  0x10   :  { %1014 = vmatpush.bf16.msra.mxu0 %v1648_v44  ;;  %v1759_v0 = vld [vmem:[%s3523_s1 + $0x120] sm:$0xf]  ;;  %v2246_v1 = vld [vmem:[%s3523_s1 + $0x124] sm:$0xf0]  ;;  %v1696_v5 = vor.u32 %v2230_v63, %v1695_v61  ;;  %v2212_v8 = vld [vmem:[%s3523_s1 + $0x14] sm:$0xf0] }
  0x11   :  { %1033 = vmatpush.bf16.msra.mxu1 %v1712_v45  ;;  %v1823_v2 = vld [vmem:[%s3523_s1 + $0x1a0] sm:$0xf]  ;;  %v2262_v3 = vld [vmem:[%s3523_s1 + $0x1a4] sm:$0xf0]  ;;  %v1760_v6 = vor.u32 %v2246_v1, %v1759_v0  ;;  %v1687_v9 = vld [vmem:[%s3523_s1 + $0x90] sm:$0xf]  ;;  %v1624_v17 = vor.u32 %v2212_v8, %v1623_v7 }
  0x12   :  { %1052 = vmatpush.bf16.msra.mxu2 %v1776_v46  ;;  %v1824_v10 = vor.u32 %v2262_v3, %v1823_v2  ;;  %v2228_v11 = vld [vmem:[%s3523_s1 + $0x94] sm:$0xf0]  ;;  %v1751_v12 = vld [vmem:[%s3523_s1 + $0x110] sm:$0xf]  ;;  %v1615_v16 = vld [vmem:[%s3523_s1] sm:$0xf] }
  0x13   :  { %1071 = vmatpush.bf16.msra.mxu3 %v1840_v50  ;;  %v2244_v13 = vld [vmem:[%s3523_s1 + $0x114] sm:$0xf0]  ;;  %v1815_v14 = vld [vmem:[%s3523_s1 + $0x190] sm:$0xf]  ;;  %v2210_v18 = vld [vmem:[%s3523_s1 + $0x4] sm:$0xf0]  ;;  %v1688_v21 = vor.u32 %v2228_v11, %v1687_v9 }
  0x14   :  { %1015 = vmatpush.bf16.msra.mxu0 %v1640_v56  ;;  %v2260_v15 = vld [vmem:[%s3523_s1 + $0x194] sm:$0xf0]  ;;  %v1679_v19 = vld [vmem:[%s3523_s1 + $0x80] sm:$0xf]  ;;  %v2226_v20 = vld [vmem:[%s3523_s1 + $0x84] sm:$0xf0]  ;;  %v1752_v22 = vor.u32 %v2244_v13, %v1751_v12  ;;  %v1616_v34 = vor.u32 %v2210_v18, %v1615_v16 }
  0x15   :  { %1034 = vmatpush.bf16.msra.mxu1 %v1704_v57  ;;  %v1743_v23 = vld [vmem:[%s3523_s1 + $0x100] sm:$0xf]  ;;  %v2242_v24 = vld [vmem:[%s3523_s1 + $0x104] sm:$0xf0]  ;;  %v1816_v26 = vor.u32 %v2260_v15, %v1815_v14  ;;  %v2195_v29 = vld [vmem:[%s3524_s0 + $0x20] sm:$0xf0]  ;;  %v1680_v38 = vor.u32 %v2226_v20, %v1679_v19 }
  0x16   :  { %1053 = vmatpush.bf16.msra.mxu2 %v1768_v58  ;;  %v1807_v25 = vld [vmem:[%s3523_s1 + $0x180] sm:$0xf]  ;;  %v2258_v27 = vld [vmem:[%s3523_s1 + $0x184] sm:$0xf0]  ;;  %v2191_v30 = vld [vmem:[%s3524_s0 + $0x4] sm:$0xf]  ;;  %v1744_v39 = vor.u32 %v2242_v24, %v1743_v23 }
  0x17   :  { %1072 = vmatpush.bf16.msra.mxu3 %v1832_v62  ;;  %v1543_v28 = vld [vmem:[%s3524_s0] sm:$0xf]  ;;  %v1545_v31 = vld [vmem:[%s3524_s0 + $0x24] sm:$0xf0]  ;;  %v1927_v32 = vld [vmem:[%s3523_s1 + $0x270] sm:$0xf]  ;;  %v1808_v43 = vor.u32 %v2258_v27, %v1807_v25 }
  0x18   :  { %1016 = vmatpush.bf16.msra.mxu0 %v1632_v4  ;;  %v2288_v33 = vld [vmem:[%s3523_s1 + $0x274] sm:$0xf0]  ;;  %v1551_v35 = vld [vmem:[%s3524_s0 + $0x8] sm:$0xf]  ;;  %v1991_v36 = vld [vmem:[%s3523_s1 + $0x2f0] sm:$0xf]  ;;  %v2651_v48 = vor.u32 %v2195_v29, %v1543_v28  ;;  %v2662_v53 = vor.u32 %v2191_v30, %v1545_v31 }
  0x19   :  { %1035 = vmatpush.bf16.msra.mxu1 %v1696_v5  ;;  %v2304_v37 = vld [vmem:[%s3523_s1 + $0x2f4] sm:$0xf0]  ;;  %v2196_v40 = vld [vmem:[%s3524_s0 + $0x28] sm:$0xf0]  ;;  %v1553_v42 = vld [vmem:[%s3524_s0 + $0x2c] sm:$0xf0]  ;;  %v1928_v44 = vor.u32 %v2288_v33, %v1927_v32 }
  0x1a   :  { %1054 = vmatpush.bf16.msra.mxu2 %v1760_v6  ;;  %v2192_v41 = vld [vmem:[%s3524_s0 + $0xc] sm:$0xf]  ;;  %v2055_v45 = vld [vmem:[%s3523_s1 + $0x370] sm:$0xf]  ;;  %v2320_v46 = vld [vmem:[%s3523_s1 + $0x374] sm:$0xf0]  ;;  %v1992_v49 = vor.u32 %v2304_v37, %v1991_v36  ;;  %v2664_v54 = vor.u32 %v2196_v40, %v1551_v35 }
  0x1b   :  { %1073 = vmatpush.bf16.msra.mxu3 %v1824_v10  ;;  %v2119_v47 = vld [vmem:[%s3523_s1 + $0x3f0] sm:$0xf]  ;;  %v2336_v50 = vld [vmem:[%s3523_s1 + $0x3f4] sm:$0xf0]  ;;  %v1919_v51 = vld [vmem:[%s3523_s1 + $0x260] sm:$0xf]  ;;  %v2672_v57 = vor.u32 %v2192_v41, %v1553_v42  ;;  %v2056_v58 = vor.u32 %v2320_v46, %v2055_v45 }
  0x1c   :  { %1017 = vmatpush.bf16.msra.mxu0 %v1624_v17  ;;  %v2286_v52 = vld [vmem:[%s3523_s1 + $0x264] sm:$0xf0]  ;;  %v1983_v55 = vld [vmem:[%s3523_s1 + $0x2e0] sm:$0xf]  ;;  %v2120_v59 = vor.u32 %v2336_v50, %v2119_v47  ;;  %v1911_v2 = vld [vmem:[%s3523_s1 + $0x250] sm:$0xf] }
  0x1d   :  { %1036 = vmatpush.bf16.msra.mxu1 %v1688_v21  ;;  %v2302_v56 = vld [vmem:[%s3523_s1 + $0x2e4] sm:$0xf0]  ;;  %v1920_v60 = vor.u32 %v2286_v52, %v1919_v51  ;;  %v2047_v61 = vld [vmem:[%s3523_s1 + $0x360] sm:$0xf]  ;;  %v2284_v3 = vld [vmem:[%s3523_s1 + $0x254] sm:$0xf0] }
  0x1e   :  { %1055 = vmatpush.bf16.msra.mxu2 %v1752_v22  ;;  %v2318_v62 = vld [vmem:[%s3523_s1 + $0x364] sm:$0xf0]  ;;  %v2111_v63 = vld [vmem:[%s3523_s1 + $0x3e0] sm:$0xf]  ;;  %v1984_v0 = vor.u32 %v2302_v56, %v1983_v55  ;;  %v1975_v4 = vld [vmem:[%s3523_s1 + $0x2d0] sm:$0xf]  ;;  %v1912_v8 = vor.u32 %v2284_v3, %v1911_v2 }
  0x1f   :  { %1074 = vmatpush.bf16.msra.mxu3 %v1816_v26  ;;  %v2334_v1 = vld [vmem:[%s3523_s1 + $0x3e4] sm:$0xf0]  ;;  %v2300_v5 = vld [vmem:[%s3523_s1 + $0x2d4] sm:$0xf0]  ;;  %v2048_v6 = vor.u32 %v2318_v62, %v2047_v61  ;;  %v2039_v9 = vld [vmem:[%s3523_s1 + $0x350] sm:$0xf] }
  0x20   :  { %1018 = vmatpush.bf16.msra.mxu0 %v1616_v34  ;;  %v2112_v7 = vor.u32 %v2334_v1, %v2111_v63  ;;  %v2316_v10 = vld [vmem:[%s3523_s1 + $0x354] sm:$0xf0]  ;;  %v2103_v11 = vld [vmem:[%s3523_s1 + $0x3d0] sm:$0xf]  ;;  %v1976_v12 = vor.u32 %v2300_v5, %v1975_v4  ;;  %v1903_v14 = vld [vmem:[%s3523_s1 + $0x240] sm:$0xf] }
  0x21   :  { %1037 = vmatpush.bf16.msra.mxu1 %v1680_v38  ;;  %v2332_v13 = vld [vmem:[%s3523_s1 + $0x3d4] sm:$0xf0]  ;;  %v2282_v15 = vld [vmem:[%s3523_s1 + $0x244] sm:$0xf0]  ;;  %v1967_v16 = vld [vmem:[%s3523_s1 + $0x2c0] sm:$0xf]  ;;  %v2040_v18 = vor.u32 %v2316_v10, %v2039_v9 }
  0x22   :  { %1056 = vmatpush.bf16.msra.mxu2 %v1744_v39  ;;  %v2298_v17 = vld [vmem:[%s3523_s1 + $0x2c4] sm:$0xf0]  ;;  %v2031_v19 = vld [vmem:[%s3523_s1 + $0x340] sm:$0xf]  ;;  %v2104_v22 = vor.u32 %v2332_v13, %v2103_v11  ;;  %v1904_v23 = vor.u32 %v2282_v15, %v1903_v14  ;;  %v2204_v26 = vld [vmem:[%s3524_s0 + $0x68] sm:$0xf0] }
  0x23   :  { %1075 = vmatpush.bf16.msra.mxu3 %v1808_v43  ;;  %1019 = vmatmul.bf16.vlgmr.msra.gmra.mxu0 %v2651_v48  ;;  %v2314_v20 = vld [vmem:[%s3523_s1 + $0x344] sm:$0xf0]  ;;  %v2095_v21 = vld [vmem:[%s3523_s1 + $0x3c0] sm:$0xf]  ;;  %v1968_v27 = vor.u32 %v2298_v17, %v1967_v16  ;;  %v2200_v28 = vld [vmem:[%s3524_s0 + $0x4c] sm:$0xf] }
  0x24   :  { %1087 = vmatpush.bf16.msrb.mxu0 %v1928_v44  ;;  %1038 = vmatmul.bf16.vlgmr.msra.gmra.mxu1 %v2662_v53  ;;  %v2330_v24 = vld [vmem:[%s3523_s1 + $0x3c4] sm:$0xf0]  ;;  %v1581_v29 = vld [vmem:[%s3524_s0 + $0x6c] sm:$0xf0]  ;;  %v2280_v31 = vld [vmem:[%s3523_s1 + $0x234] sm:$0xf0]  ;;  %v2032_v35 = vor.u32 %v2314_v20, %v2031_v19 }
  0x25   :  { %1106 = vmatpush.bf16.msrb.mxu1 %v1992_v49  ;;  %1057 = vmatmul.bf16.vlgmr.msra.gmra.mxu2 %v2664_v54  ;;  %v1579_v25 = vld [vmem:[%s3524_s0 + $0x48] sm:$0xf]  ;;  %v1895_v30 = vld [vmem:[%s3523_s1 + $0x230] sm:$0xf]  ;;  %v2296_v34 = vld [vmem:[%s3523_s1 + $0x2b4] sm:$0xf0]  ;;  %v2096_v39 = vor.u32 %v2330_v24, %v2095_v21  ;;  %v2794_v50 = vor.u32 %v2200_v28, %v1581_v29 }
  0x26   :  { %1076 = vmatmul.bf16.vlgmr.msra.gmra.mxu3 %v2672_v57  ;;  %1125 = vmatpush.bf16.msrb.mxu2 %v2056_v58  ;;  %v1587_v32 = vld [vmem:[%s3524_s0 + $0x50] sm:$0xf]  ;;  %v2205_v36 = vld [vmem:[%s3524_s0 + $0x70] sm:$0xf0]  ;;  %v1589_v38 = vld [vmem:[%s3524_s0 + $0x74] sm:$0xf0]  ;;  %v1896_v40 = vor.u32 %v2280_v31, %v1895_v30  ;;  %v2783_v44 = vor.u32 %v2204_v26, %v1579_v25 }
  0x27   :  { %1144 = vmatpush.bf16.msrb.mxu3 %v2120_v59  ;;  %v1959_v33 = vld [vmem:[%s3523_s1 + $0x2b0] sm:$0xf]  ;;  %v2201_v37 = vld [vmem:[%s3524_s0 + $0x54] sm:$0xf]  ;;  %v2312_v42 = vld [vmem:[%s3523_s1 + $0x334] sm:$0xf0]  ;;  %v2796_v51 = vor.u32 %v2205_v36, %v1587_v32 }
  0x28   :  { %1088 = vmatpush.bf16.msrb.mxu0 %v1920_v60  ;;  %v2023_v41 = vld [vmem:[%s3523_s1 + $0x330] sm:$0xf]  ;;  %v1960_v45 = vor.u32 %v2296_v34, %v1959_v33  ;;  %v2328_v46 = vld [vmem:[%s3523_s1 + $0x3b4] sm:$0xf0]  ;;  %v1887_v47 = vld [vmem:[%s3523_s1 + $0x220] sm:$0xf]  ;;  %v2804_v56 = vor.u32 %v2201_v37, %v1589_v38 }
  0x29   :  { %1107 = vmatpush.bf16.msrb.mxu1 %v1984_v0  ;;  %v2087_v43 = vld [vmem:[%s3523_s1 + $0x3b0] sm:$0xf]  ;;  %v2278_v49 = vld [vmem:[%s3523_s1 + $0x224] sm:$0xf0]  ;;  %v1951_v52 = vld [vmem:[%s3523_s1 + $0x2a0] sm:$0xf]  ;;  %v2024_v58 = vor.u32 %v2312_v42, %v2023_v41 }
  0x2a   :  { %1126 = vmatpush.bf16.msrb.mxu2 %v2048_v6  ;;  %v2294_v55 = vld [vmem:[%s3523_s1 + $0x2a4] sm:$0xf0]  ;;  %v2088_v59 = vor.u32 %v2328_v46, %v2087_v43  ;;  %v1888_v60 = vor.u32 %v2278_v49, %v1887_v47  ;;  %v2015_v61 = vld [vmem:[%s3523_s1 + $0x320] sm:$0xf]  ;;  %v1879_v2 = vld [vmem:[%s3523_s1 + $0x210] sm:$0xf] }
  0x2b   :  { %1145 = vmatpush.bf16.msrb.mxu3 %v2112_v7  ;;  %v2310_v62 = vld [vmem:[%s3523_s1 + $0x324] sm:$0xf0]  ;;  %v2079_v63 = vld [vmem:[%s3523_s1 + $0x3a0] sm:$0xf]  ;;  %v1952_v0 = vor.u32 %v2294_v55, %v1951_v52  ;;  %v2276_v3 = vld [vmem:[%s3523_s1 + $0x214] sm:$0xf0] }
  0x2c   :  { %1089 = vmatpush.bf16.msrb.mxu0 %v1912_v8  ;;  %v2326_v1 = vld [vmem:[%s3523_s1 + $0x3a4] sm:$0xf0]  ;;  %v1943_v4 = vld [vmem:[%s3523_s1 + $0x290] sm:$0xf]  ;;  %v2292_v5 = vld [vmem:[%s3523_s1 + $0x294] sm:$0xf0]  ;;  %v2016_v6 = vor.u32 %v2310_v62, %v2015_v61  ;;  %v1880_v10 = vor.u32 %v2276_v3, %v1879_v2 }
  0x2d   :  { %1108 = vmatpush.bf16.msrb.mxu1 %v1976_v12  ;;  %v2007_v7 = vld [vmem:[%s3523_s1 + $0x310] sm:$0xf]  ;;  %v2308_v8 = vld [vmem:[%s3523_s1 + $0x314] sm:$0xf0]  ;;  %v2080_v9 = vor.u32 %v2326_v1, %v2079_v63  ;;  %v1871_v13 = vld [vmem:[%s3523_s1 + $0x200] sm:$0xf]  ;;  %v1944_v14 = vor.u32 %v2292_v5, %v1943_v4 }
  0x2e   :  { %1127 = vmatpush.bf16.msrb.mxu2 %v2040_v18  ;;  %v2071_v11 = vld [vmem:[%s3523_s1 + $0x390] sm:$0xf]  ;;  %v2324_v12 = vld [vmem:[%s3523_s1 + $0x394] sm:$0xf0]  ;;  %v2274_v15 = vld [vmem:[%s3523_s1 + $0x204] sm:$0xf0] }
  0x2f   :  { %1146 = vmatpush.bf16.msrb.mxu3 %v2104_v22  ;;  %v1935_v16 = vld [vmem:[%s3523_s1 + $0x280] sm:$0xf]  ;;  %v2290_v17 = vld [vmem:[%s3523_s1 + $0x284] sm:$0xf0]  ;;  %v2183_v20 = vld [vmem:[%s3523_s1 + $0x470] sm:$0xf]  ;;  %v2008_v22 = vor.u32 %v2308_v8, %v2007_v7  ;;  %v2072_v26 = vor.u32 %v2324_v12, %v2071_v11 }
  0x30   :  { %1090 = vmatpush.bf16.msrb.mxu0 %v1904_v23  ;;  %v1999_v18 = vld [vmem:[%s3523_s1 + $0x300] sm:$0xf]  ;;  %v2306_v19 = vld [vmem:[%s3523_s1 + $0x304] sm:$0xf0]  ;;  %v2352_v21 = vld [vmem:[%s3523_s1 + $0x474] sm:$0xf0]  ;;  %v1936_v31 = vor.u32 %v2290_v17, %v1935_v16 }
  0x31   :  { %1109 = vmatpush.bf16.msrb.mxu1 %v1968_v27  ;;  %v2063_v23 = vld [vmem:[%s3523_s1 + $0x380] sm:$0xf]  ;;  %v2223_v24 = vld [vmem:[%s3523_s1 + $0x74] sm:$0xf]  ;;  %v1673_v25 = vld [vmem:[%s3523_s1 + $0x78] sm:$0xf0]  ;;  %v1872_v27 = vor.u32 %v2274_v15, %v1871_v13  ;;  %v2184_v34 = vor.u32 %v2352_v21, %v2183_v20  ;;  %v2000_v41 = vor.u32 %v2306_v19, %v1999_v18 }
  0x32   :  { %1128 = vmatpush.bf16.msrb.mxu2 %v2032_v35  ;;  %v2322_v28 = vld [vmem:[%s3523_s1 + $0x384] sm:$0xf0]  ;;  %v1559_v29 = vld [vmem:[%s3524_s0 + $0x10] sm:$0xf]  ;;  %v2197_v30 = vld [vmem:[%s3524_s0 + $0x30] sm:$0xf0]  ;;  %v1676_v38 = vor.u32 %v2223_v24, %v1673_v25 }
  0x33   :  { %1147 = vmatpush.bf16.msrb.mxu3 %v2096_v39  ;;  %1024 = vmatmul.bf16.gmra.mxu0 %v2783_v44  ;;  %v2193_v32 = vld [vmem:[%s3524_s0 + $0x14] sm:$0xf]  ;;  %v1561_v33 = vld [vmem:[%s3524_s0 + $0x34] sm:$0xf0]  ;;  %v1737_v36 = vld [vmem:[%s3523_s1 + $0xf8] sm:$0xf0]  ;;  %v2064_v46 = vor.u32 %v2322_v28, %v2063_v23 }
  0x34   :  { %1091 = vmatpush.bf16.msrb.mxu0 %v1896_v40  ;;  %1043 = vmatmul.bf16.gmra.mxu1 %v2794_v50  ;;  %v2239_v35 = vld [vmem:[%s3523_s1 + $0xf4] sm:$0xf]  ;;  %v1567_v37 = vld [vmem:[%s3524_s0 + $0x18] sm:$0xf]  ;;  %v1801_v40 = vld [vmem:[%s3523_s1 + $0x178] sm:$0xf0]  ;;  %v2938_v63 = vor.u32 %v2193_v32, %v1561_v33 }
  0x35   :  { %1110 = vmatpush.bf16.msrb.mxu1 %v1960_v45  ;;  %1062 = vmatmul.bf16.gmra.mxu2 %v2796_v51  ;;  %v2255_v39 = vld [vmem:[%s3523_s1 + $0x174] sm:$0xf]  ;;  %v2198_v42 = vld [vmem:[%s3524_s0 + $0x38] sm:$0xf0]  ;;  %v1569_v45 = vld [vmem:[%s3524_s0 + $0x3c] sm:$0xf0]  ;;  %v1740_v47 = vor.u32 %v2239_v35, %v1737_v36 }
  0x36   :  { %1081 = vmatmul.bf16.gmra.mxu3 %v2804_v56  ;;  %1129 = vmatpush.bf16.msrb.mxu2 %v2024_v58  ;;  %v2194_v43 = vld [vmem:[%s3524_s0 + $0x1c] sm:$0xf]  ;;  %v2175_v49 = vld [vmem:[%s3523_s1 + $0x460] sm:$0xf]  ;;  %v2350_v52 = vld [vmem:[%s3523_s1 + $0x464] sm:$0xf0]  ;;  %v2927_v58 = vor.u32 %v2197_v30, %v1559_v29 }
  0x37   :  { %1148 = vmatpush.bf16.msrb.mxu3 %v2088_v59  ;;  %v2221_v55 = vld [vmem:[%s3523_s1 + $0x64] sm:$0xf]  ;;  %v1804_v59 = vor.u32 %v2255_v39, %v1801_v40  ;;  %v1729_v62 = vld [vmem:[%s3523_s1 + $0xe8] sm:$0xf0]  ;;  %v2948_v3 = vor.u32 %v2194_v43, %v1569_v45  ;;  %v2176_v4 = vor.u32 %v2350_v52, %v2175_v49  ;;  %v2167_v7 = vld [vmem:[%s3523_s1 + $0x450] sm:$0xf] }
  0x38   :  { %1092 = vmatpush.bf16.msrb.mxu0 %v1888_v60  ;;  %v1665_v60 = vld [vmem:[%s3523_s1 + $0x68] sm:$0xf0]  ;;  %v2237_v61 = vld [vmem:[%s3523_s1 + $0xe4] sm:$0xf]  ;;  %v2348_v8 = vld [vmem:[%s3523_s1 + $0x454] sm:$0xf0] }
  0x39   :  { %1111 = vmatpush.bf16.msrb.mxu1 %v1952_v0  ;;  %v2940_v0 = vor.u32 %v2198_v42, %v1567_v37  ;;  %v2253_v1 = vld [vmem:[%s3523_s1 + $0x164] sm:$0xf]  ;;  %v1793_v2 = vld [vmem:[%s3523_s1 + $0x168] sm:$0xf0]  ;;  %v1668_v5 = vor.u32 %v2221_v55, %v1665_v60  ;;  %v1657_v11 = vld [vmem:[%s3523_s1 + $0x58] sm:$0xf0]  ;;  %v2168_v16 = vor.u32 %v2348_v8, %v2167_v7 }
  0x3a   :  { %1130 = vmatpush.bf16.msrb.mxu2 %v2016_v6  ;;  %v1732_v6 = vor.u32 %v2237_v61, %v1729_v62  ;;  %v2235_v12 = vld [vmem:[%s3523_s1 + $0xd4] sm:$0xf]  ;;  %v1721_v13 = vld [vmem:[%s3523_s1 + $0xd8] sm:$0xf0]  ;;  %v2159_v19 = vld [vmem:[%s3523_s1 + $0x440] sm:$0xf] }
  0x3b   :  { %1149 = vmatpush.bf16.msrb.mxu3 %v2080_v9  ;;  %v2219_v9 = vld [vmem:[%s3523_s1 + $0x54] sm:$0xf]  ;;  %v1785_v15 = vld [vmem:[%s3523_s1 + $0x158] sm:$0xf0]  ;;  %v1724_v18 = vor.u32 %v2235_v12, %v1721_v13  ;;  %v2346_v20 = vld [vmem:[%s3523_s1 + $0x444] sm:$0xf0] }
  0x3c   :  { %1093 = vmatpush.bf16.msrb.mxu0 %v1880_v10  ;;  %v1796_v10 = vor.u32 %v2253_v1, %v1793_v2  ;;  %v1660_v17 = vor.u32 %v2219_v9, %v1657_v11  ;;  %v2217_v21 = vld [vmem:[%s3523_s1 + $0x44] sm:$0xf]  ;;  %v1649_v23 = vld [vmem:[%s3523_s1 + $0x48] sm:$0xf0]  ;;  %v2160_v28 = vor.u32 %v2346_v20, %v2159_v19  ;;  %v2206_v32 = vld [vmem:[%s3524_s0 + $0x78] sm:$0xf0] }
  0x3d   :  { %1112 = vmatpush.bf16.msrb.mxu1 %v1944_v14  ;;  %v2251_v14 = vld [vmem:[%s3523_s1 + $0x154] sm:$0xf]  ;;  %v2233_v24 = vld [vmem:[%s3523_s1 + $0xc4] sm:$0xf]  ;;  %v1713_v25 = vld [vmem:[%s3523_s1 + $0xc8] sm:$0xf0]  ;;  %v1652_v29 = vor.u32 %v2217_v21, %v1649_v23 }
  0x3e   :  { %1131 = vmatpush.bf16.msrb.mxu2 %v2008_v22  ;;  %v1788_v22 = vor.u32 %v2251_v14, %v1785_v15  ;;  %v1716_v30 = vor.u32 %v2233_v24, %v1713_v25  ;;  %v2151_v33 = vld [vmem:[%s3523_s1 + $0x430] sm:$0xf]  ;;  %v2215_v35 = vld [vmem:[%s3523_s1 + $0x34] sm:$0xf]  ;;  %v2202_v37 = vld [vmem:[%s3524_s0 + $0x5c] sm:$0xf] }
  0x3f   :  { %1150 = vmatpush.bf16.msrb.mxu3 %v2072_v26  ;;  %v2249_v26 = vld [vmem:[%s3523_s1 + $0x144] sm:$0xf]  ;;  %v1641_v39 = vld [vmem:[%s3523_s1 + $0x38] sm:$0xf0]  ;;  %v2231_v40 = vld [vmem:[%s3523_s1 + $0xb4] sm:$0xf] }
  0x40   :  { %1094 = vmatpush.bf16.msrb.mxu0 %v1872_v27  ;;  %v1777_v27 = vld [vmem:[%s3523_s1 + $0x148] sm:$0xf0]  ;;  %v1603_v42 = vld [vmem:[%s3524_s0 + $0x60] sm:$0xf]  ;;  %v2247_v43 = vld [vmem:[%s3523_s1 + $0x134] sm:$0xf]  ;;  %v1644_v55 = vor.u32 %v2215_v35, %v1641_v39 }
  0x41   :  { %1113 = vmatpush.bf16.msrb.mxu1 %v1936_v31  ;;  %v1595_v31 = vld [vmem:[%s3524_s0 + $0x58] sm:$0xf]  ;;  %v1780_v36 = vor.u32 %v2249_v26, %v1777_v27  ;;  %v1769_v45 = vld [vmem:[%s3523_s1 + $0x138] sm:$0xf0]  ;;  %v1605_v49 = vld [vmem:[%s3524_s0 + $0x84] sm:$0xf0] }
  0x42   :  { %1132 = vmatpush.bf16.msrb.mxu2 %v2000_v41  ;;  %v1705_v41 = vld [vmem:[%s3523_s1 + $0xb8] sm:$0xf0]  ;;  %v2143_v60 = vld [vmem:[%s3523_s1 + $0x420] sm:$0xf]  ;;  %v2342_v61 = vld [vmem:[%s3523_s1 + $0x424] sm:$0xf0]  ;;  %v3059_v1 = vor.u32 %v2206_v32, %v1595_v31  ;;  %v1772_v2 = vor.u32 %v2247_v43, %v1769_v45 }
  0x43   :  { %1151 = vmatpush.bf16.msrb.mxu3 %v2064_v46  ;;  %1095 = vmatmul.bf16.vlgmr.msrb.gmra.mxu0 %v2927_v58  ;;  %v2207_v46 = vld [vmem:[%s3524_s0 + $0x80] sm:$0xf0]  ;;  %v2144_v12 = vor.u32 %v2342_v61, %v2143_v60  ;;  %v2135_v15 = vld [vmem:[%s3523_s1 + $0x410] sm:$0xf]  ;;  %v1625_v19 = vld [vmem:[%s3523_s1 + $0x18] sm:$0xf0] }
  0x44   :  { %1163 = vmatpush.bf16.msra.mxu0 %v2184_v34  ;;  %1114 = vmatmul.bf16.vlgmr.msrb.gmra.mxu1 %v2938_v63  ;;  %v2344_v34 = vld [vmem:[%s3523_s1 + $0x434] sm:$0xf0]  ;;  %v2213_v62 = vld [vmem:[%s3523_s1 + $0x24] sm:$0xf]  ;;  %v3072_v8 = vor.u32 %v2207_v46, %v1603_v42  ;;  %v2227_v20 = vld [vmem:[%s3523_s1 + $0x94] sm:$0xf] }
  0x45   :  { %1182 = vmatpush.bf16.msra.mxu1 %v1676_v38  ;;  %1133 = vmatmul.bf16.vlgmr.msrb.gmra.mxu2 %v2940_v0  ;;  %v1597_v38 = vld [vmem:[%s3524_s0 + $0x7c] sm:$0xf0]  ;;  %v2152_v52 = vor.u32 %v2344_v34, %v2151_v33  ;;  %v2245_v9 = vld [vmem:[%s3523_s1 + $0x124] sm:$0xf]  ;;  %v1689_v21 = vld [vmem:[%s3523_s1 + $0x98] sm:$0xf0] }
  0x46   :  { %1201 = vmatpush.bf16.msra.mxu2 %v1740_v47  ;;  %1152 = vmatmul.bf16.vlgmr.msrb.gmra.mxu3 %v2948_v3  ;;  %v2203_v47 = vld [vmem:[%s3524_s0 + $0x64] sm:$0xf]  ;;  %v3070_v7 = vor.u32 %v2202_v37, %v1597_v38  ;;  %v1753_v23 = vld [vmem:[%s3523_s1 + $0x118] sm:$0xf0]  ;;  %v2127_v25 = vld [vmem:[%s3523_s1 + $0x400] sm:$0xf] }
  0x47   :  { %1220 = vmatpush.bf16.msra.mxu3 %v1804_v59  ;;  %v1708_v59 = vor.u32 %v2231_v40, %v1705_v41  ;;  %v3080_v11 = vor.u32 %v2203_v47, %v1605_v49  ;;  %v2338_v26 = vld [vmem:[%s3523_s1 + $0x404] sm:$0xf0]  ;;  %v2225_v31 = vld [vmem:[%s3523_s1 + $0x84] sm:$0xf]  ;;  %v1681_v33 = vld [vmem:[%s3523_s1 + $0x88] sm:$0xf0] }
  0x48   :  { %1164 = vmatpush.bf16.msra.mxu0 %v2176_v4  ;;  %v1633_v4 = vld [vmem:[%s3523_s1 + $0x28] sm:$0xf0]  ;;  %v2241_v34 = vld [vmem:[%s3523_s1 + $0x104] sm:$0xf]  ;;  %v1865_v37 = vld [vmem:[%s3523_s1 + $0x1f8] sm:$0xf0]  ;;  %v2128_v39 = vor.u32 %v2338_v26, %v2127_v25  ;;  %v1684_v45 = vor.u32 %v2225_v31, %v1681_v33 }
  0x49   :  { %1183 = vmatpush.bf16.msra.mxu1 %v1668_v5  ;;  %v2229_v5 = vld [vmem:[%s3523_s1 + $0xa4] sm:$0xf]  ;;  %v1636_v13 = vor.u32 %v2213_v62, %v1633_v4  ;;  %v1745_v35 = vld [vmem:[%s3523_s1 + $0x108] sm:$0xf0]  ;;  %v2287_v38 = vld [vmem:[%s3523_s1 + $0x274] sm:$0xf] }
  0x4a   :  { %1202 = vmatpush.bf16.msra.mxu2 %v1732_v6  ;;  %v1697_v6 = vld [vmem:[%s3523_s1 + $0xa8] sm:$0xf0]  ;;  %v1929_v40 = vld [vmem:[%s3523_s1 + $0x278] sm:$0xf0]  ;;  %v2303_v41 = vld [vmem:[%s3523_s1 + $0x2f4] sm:$0xf]  ;;  %v1748_v49 = vor.u32 %v2241_v34, %v1745_v35 }
  0x4b   :  { %1221 = vmatpush.bf16.msra.mxu3 %v1796_v10  ;;  %v1761_v10 = vld [vmem:[%s3523_s1 + $0x128] sm:$0xf0]  ;;  %v1700_v14 = vor.u32 %v2229_v5, %v1697_v6  ;;  %v1993_v42 = vld [vmem:[%s3523_s1 + $0x2f8] sm:$0xf0]  ;;  %v2319_v46 = vld [vmem:[%s3523_s1 + $0x374] sm:$0xf]  ;;  %v1932_v60 = vor.u32 %v2287_v38, %v1929_v40 }
  0x4c   :  { %1165 = vmatpush.bf16.msra.mxu0 %v2168_v16  ;;  %v2340_v16 = vld [vmem:[%s3523_s1 + $0x414] sm:$0xf0]  ;;  %v2057_v47 = vld [vmem:[%s3523_s1 + $0x378] sm:$0xf0]  ;;  %v1996_v61 = vor.u32 %v2303_v41, %v1993_v42  ;;  %v1857_v4 = vld [vmem:[%s3523_s1 + $0x1e8] sm:$0xf0] }
  0x4d   :  { %1184 = vmatpush.bf16.msra.mxu1 %v1660_v17  ;;  %v2211_v17 = vld [vmem:[%s3523_s1 + $0x14] sm:$0xf]  ;;  %v2136_v24 = vor.u32 %v2340_v16, %v2135_v15  ;;  %v2060_v62 = vor.u32 %v2319_v46, %v2057_v47  ;;  %v2285_v5 = vld [vmem:[%s3523_s1 + $0x264] sm:$0xf]  ;;  %v2041_v26 = vld [vmem:[%s3523_s1 + $0x358] sm:$0xf0] }
  0x4e   :  { %1203 = vmatpush.bf16.msra.mxu2 %v1724_v18  ;;  %v1764_v18 = vor.u32 %v2245_v9, %v1761_v10  ;;  %v1628_v27 = vor.u32 %v2211_v17, %v1625_v19  ;;  %v1921_v9 = vld [vmem:[%s3523_s1 + $0x268] sm:$0xf0]  ;;  %v2301_v10 = vld [vmem:[%s3523_s1 + $0x2e4] sm:$0xf]  ;;  %v1849_v19 = vld [vmem:[%s3523_s1 + $0x1d8] sm:$0xf0] }
  0x4f   :  { %1222 = vmatpush.bf16.msra.mxu3 %v1788_v22  ;;  %v2243_v22 = vld [vmem:[%s3523_s1 + $0x114] sm:$0xf]  ;;  %v1924_v16 = vor.u32 %v2285_v5, %v1921_v9  ;;  %v1905_v31 = vld [vmem:[%s3523_s1 + $0x248] sm:$0xf0]  ;;  %v2313_v34 = vld [vmem:[%s3523_s1 + $0x344] sm:$0xf] }
  0x50   :  { %1166 = vmatpush.bf16.msra.mxu0 %v2160_v28  ;;  %v1692_v28 = vor.u32 %v2227_v20, %v1689_v21  ;;  %v1756_v32 = vor.u32 %v2243_v22, %v1753_v23  ;;  %v2283_v20 = vld [vmem:[%s3523_s1 + $0x254] sm:$0xf]  ;;  %v1913_v22 = vld [vmem:[%s3523_s1 + $0x258] sm:$0xf0]  ;;  %v1969_v33 = vld [vmem:[%s3523_s1 + $0x2c8] sm:$0xf0] }
  0x51   :  { %1185 = vmatpush.bf16.msra.mxu1 %v1652_v29  ;;  %v2209_v29 = vld [vmem:[%s3523_s1 + $0x4] sm:$0xf]  ;;  %v2299_v23 = vld [vmem:[%s3523_s1 + $0x2d4] sm:$0xf]  ;;  %v2033_v35 = vld [vmem:[%s3523_s1 + $0x348] sm:$0xf0] }
  0x52   :  { %1204 = vmatpush.bf16.msra.mxu2 %v1716_v30  ;;  %v1617_v30 = vld [vmem:[%s3523_s1 + $0x8] sm:$0xf0]  ;;  %v2315_v25 = vld [vmem:[%s3523_s1 + $0x354] sm:$0xf]  ;;  %v1833_v41 = vld [vmem:[%s3523_s1 + $0x1b8] sm:$0xf0] }
  0x53   :  { %1223 = vmatpush.bf16.msra.mxu3 %v1780_v36  ;;  %1100 = vmatmul.bf16.gmra.mxu0 %v3059_v1  ;;  %v2271_v36 = vld [vmem:[%s3523_s1 + $0x1f4] sm:$0xf]  ;;  %v1620_v43 = vor.u32 %v2209_v29, %v1617_v30  ;;  %v2281_v30 = vld [vmem:[%s3523_s1 + $0x244] sm:$0xf]  ;;  %v1961_v47 = vld [vmem:[%s3523_s1 + $0x2b8] sm:$0xf0] }
  0x54   :  { %1167 = vmatpush.bf16.msra.mxu0 %v2152_v52  ;;  %1119 = vmatmul.bf16.gmra.mxu1 %v3070_v7  ;;  %v1868_v52 = vor.u32 %v2271_v36, %v1865_v37  ;;  %v1908_v37 = vor.u32 %v2281_v30, %v1905_v31  ;;  %v2263_v40 = vld [vmem:[%s3523_s1 + $0x1b4] sm:$0xf]  ;;  %v1937_v31 = vld [vmem:[%s3523_s1 + $0x288] sm:$0xf0] }
  0x55   :  { %1186 = vmatpush.bf16.msra.mxu1 %v1644_v55  ;;  %1138 = vmatmul.bf16.gmra.mxu2 %v3072_v8  ;;  %v1575_v55 = vld [vmem:[%s3524_s0 + $0x20] sm:$0xf]  ;;  %v2279_v42 = vld [vmem:[%s3523_s1 + $0x234] sm:$0xf] }
  0x56   :  { %1205 = vmatpush.bf16.msra.mxu2 %v1708_v59  ;;  %1157 = vmatmul.bf16.gmra.mxu3 %v3080_v11  ;;  %v2199_v59 = vld [vmem:[%s3524_s0 + $0x40] sm:$0xf0]  ;;  %v2295_v46 = vld [vmem:[%s3523_s1 + $0x2b4] sm:$0xf] }
  0x57   :  { %1224 = vmatpush.bf16.msra.mxu3 %v1772_v2  ;;  %v2269_v2 = vld [vmem:[%s3523_s1 + $0x1e4] sm:$0xf]  ;;  %v3173_v6 = vor.u32 %v2199_v59, %v1575_v55  ;;  %v2025_v55 = vld [vmem:[%s3523_s1 + $0x338] sm:$0xf0]  ;;  %v1836_v59 = vor.u32 %v2263_v40, %v1833_v41 }
  0x58   :  { %1168 = vmatpush.bf16.msra.mxu0 %v2144_v12  ;;  %v1985_v12 = vld [vmem:[%s3523_s1 + $0x2e8] sm:$0xf0]  ;;  %v1860_v15 = vor.u32 %v2269_v2, %v1857_v4  ;;  %v2277_v4 = vld [vmem:[%s3523_s1 + $0x224] sm:$0xf] }
  0x59   :  { %1187 = vmatpush.bf16.msra.mxu1 %v1636_v13  ;;  %v2317_v13 = vld [vmem:[%s3523_s1 + $0x364] sm:$0xf]  ;;  %v1988_v17 = vor.u32 %v2301_v10, %v1985_v12  ;;  %v1825_v2 = vld [vmem:[%s3523_s1 + $0x1a8] sm:$0xf0] }
  0x5a   :  { %1206 = vmatpush.bf16.msra.mxu2 %v1700_v14  ;;  %v2049_v14 = vld [vmem:[%s3523_s1 + $0x368] sm:$0xf0]  ;;  %v2293_v12 = vld [vmem:[%s3523_s1 + $0x2a4] sm:$0xf] }
  0x5b   :  { %1225 = vmatpush.bf16.msra.mxu3 %v1764_v18  ;;  %v2267_v18 = vld [vmem:[%s3523_s1 + $0x1d4] sm:$0xf]  ;;  %v2052_v21 = vor.u32 %v2317_v13, %v2049_v14  ;;  %v1889_v10 = vld [vmem:[%s3523_s1 + $0x228] sm:$0xf0]  ;;  %v2309_v14 = vld [vmem:[%s3523_s1 + $0x324] sm:$0xf] }
  0x5c   :  { %1169 = vmatpush.bf16.msra.mxu0 %v2136_v24  ;;  %v1977_v24 = vld [vmem:[%s3523_s1 + $0x2d8] sm:$0xf0]  ;;  %v1953_v13 = vld [vmem:[%s3523_s1 + $0x2a8] sm:$0xf0] }
  0x5d   :  { %1188 = vmatpush.bf16.msra.mxu1 %v1628_v27  ;;  %v1852_v27 = vor.u32 %v2267_v18, %v1849_v19  ;;  %v1980_v29 = vor.u32 %v2299_v23, %v1977_v24  ;;  %v1956_v18 = vor.u32 %v2293_v12, %v1953_v13  ;;  %v2259_v19 = vld [vmem:[%s3523_s1 + $0x194] sm:$0xf]  ;;  %v1881_v23 = vld [vmem:[%s3523_s1 + $0x218] sm:$0xf0] }
  0x5e   :  { %1207 = vmatpush.bf16.msra.mxu2 %v1692_v28  ;;  %v1916_v28 = vor.u32 %v2283_v20, %v1913_v22  ;;  %v1817_v20 = vld [vmem:[%s3523_s1 + $0x198] sm:$0xf0]  ;;  %v2291_v24 = vld [vmem:[%s3523_s1 + $0x294] sm:$0xf] }
  0x5f   :  { %1226 = vmatpush.bf16.msra.mxu3 %v1756_v32  ;;  %v2297_v32 = vld [vmem:[%s3523_s1 + $0x2c4] sm:$0xf]  ;;  %v2327_v12 = vld [vmem:[%s3523_s1 + $0x3b4] sm:$0xf]  ;;  %v2089_v13 = vld [vmem:[%s3523_s1 + $0x3b8] sm:$0xf0] }
  0x60   :  { %1170 = vmatpush.bf16.msra.mxu0 %v2128_v39  ;;  %v1972_v38 = vor.u32 %v2297_v32, %v1969_v33  ;;  %v1611_v39 = vld [vmem:[%s3524_s0 + $0x68] sm:$0xf]  ;;  %v2305_v32 = vld [vmem:[%s3523_s1 + $0x304] sm:$0xf]  ;;  %v2001_v33 = vld [vmem:[%s3523_s1 + $0x308] sm:$0xf0] }
  0x61   :  { %1189 = vmatpush.bf16.msra.mxu1 %v1620_v43  ;;  %v2036_v43 = vor.u32 %v2313_v34, %v2033_v35  ;;  %v2335_v34 = vld [vmem:[%s3523_s1 + $0x3f4] sm:$0xf]  ;;  %v2121_v35 = vld [vmem:[%s3523_s1 + $0x3f8] sm:$0xf0]  ;;  %v2004_v41 = vor.u32 %v2305_v32, %v2001_v33 }
  0x62   :  { %1208 = vmatpush.bf16.msra.mxu2 %v1684_v45  ;;  %v1897_v45 = vld [vmem:[%s3523_s1 + $0x238] sm:$0xf0] }
  0x63   :  { %1227 = vmatpush.bf16.msra.mxu3 %v1748_v49  ;;  %1171 = vmatmul.bf16.vlgmr.msra.gmra.mxu0 %v3173_v6  ;;  %v2208_v49 = vld [vmem:[%s3524_s0 + $0x88] sm:$0xf0] }
  0x64   :  { %1239 = vmatpush.bf16.msrb.mxu0 %v1868_v52  ;;  %1190 = vmatmul.bf16.vlgmr.msra.gmra.mxu1 %v2651_v48  ;;  %v2265_v48 = vld [vmem:[%s3523_s1 + $0x1c4] sm:$0xf]  ;;  %v2311_v52 = vld [vmem:[%s3523_s1 + $0x334] sm:$0xf]  ;;  %v3281_v5 = vor.u32 %v2208_v49, %v1611_v39  ;;  %v2177_v49 = vld [vmem:[%s3523_s1 + $0x468] sm:$0xf0] }
  0x65   :  { %1258 = vmatpush.bf16.msrb.mxu1 %v1932_v60  ;;  %1209 = vmatmul.bf16.vlgmr.msra.gmra.mxu2 %v2662_v53  ;;  %v1841_v53 = vld [vmem:[%s3523_s1 + $0x1c8] sm:$0xf0]  ;;  %v1900_v60 = vor.u32 %v2279_v42, %v1897_v45  ;;  %v2028_v9 = vor.u32 %v2311_v52, %v2025_v55  ;;  %v2124_v42 = vor.u32 %v2335_v34, %v2121_v35  ;;  %v2333_v45 = vld [vmem:[%s3523_s1 + $0x3e4] sm:$0xf] }
  0x66   :  { %1277 = vmatpush.bf16.msrb.mxu2 %v1996_v61  ;;  %1228 = vmatmul.bf16.vlgmr.msra.gmra.mxu3 %v2664_v54  ;;  %v2044_v54 = vor.u32 %v2315_v25, %v2041_v26  ;;  %v1844_v36 = vor.u32 %v2265_v48, %v1841_v53  ;;  %v1964_v61 = vor.u32 %v2295_v46, %v1961_v47  ;;  %v1945_v25 = vld [vmem:[%s3523_s1 + $0x298] sm:$0xf0]  ;;  %v2307_v26 = vld [vmem:[%s3523_s1 + $0x314] sm:$0xf]  ;;  %v1809_v48 = vld [vmem:[%s3523_s1 + $0x188] sm:$0xf0] }
  0x67   :  { %1296 = vmatpush.bf16.msrb.mxu3 %v2060_v62  ;;  %v2261_v62 = vld [vmem:[%s3523_s1 + $0x1a4] sm:$0xf]  ;;  %v2113_v46 = vld [vmem:[%s3523_s1 + $0x3e8] sm:$0xf0] }
  0x68   :  { %1240 = vmatpush.bf16.msrb.mxu0 %v1860_v15  ;;  %v2017_v15 = vld [vmem:[%s3523_s1 + $0x328] sm:$0xf0]  ;;  %v2273_v53 = vld [vmem:[%s3523_s1 + $0x204] sm:$0xf]  ;;  %v2116_v52 = vor.u32 %v2333_v45, %v2113_v46 }
  0x69   :  { %1259 = vmatpush.bf16.msrb.mxu1 %v1924_v16  ;;  %v1828_v16 = vor.u32 %v2261_v62, %v1825_v2  ;;  %v2020_v22 = vor.u32 %v2309_v14, %v2017_v15  ;;  %v2349_v47 = vld [vmem:[%s3523_s1 + $0x464] sm:$0xf]  ;;  %v2169_v62 = vld [vmem:[%s3523_s1 + $0x458] sm:$0xf0]  ;;  %v2343_v14 = vld [vmem:[%s3523_s1 + $0x434] sm:$0xf] }
  0x6a   :  { %1278 = vmatpush.bf16.msrb.mxu2 %v1988_v17  ;;  %v1892_v17 = vor.u32 %v2277_v4, %v1889_v10  ;;  %v2180_v55 = vor.u32 %v2349_v47, %v2177_v49  ;;  %v2153_v15 = vld [vmem:[%s3523_s1 + $0x438] sm:$0xf0] }
  0x6b   :  { %1297 = vmatpush.bf16.msrb.mxu3 %v2052_v21  ;;  %v2275_v21 = vld [vmem:[%s3523_s1 + $0x214] sm:$0xf] }
  0x6c   :  { %1241 = vmatpush.bf16.msrb.mxu0 %v1852_v27  ;;  %v2009_v27 = vld [vmem:[%s3523_s1 + $0x318] sm:$0xf0] }
  0x6d   :  { %1260 = vmatpush.bf16.msrb.mxu1 %v1916_v28  ;;  %v1820_v28 = vor.u32 %v2259_v19, %v1817_v20  ;;  %v2012_v30 = vor.u32 %v2307_v26, %v2009_v27  ;;  %v2081_v19 = vld [vmem:[%s3523_s1 + $0x3a8] sm:$0xf0]  ;;  %v2341_v20 = vld [vmem:[%s3523_s1 + $0x424] sm:$0xf]  ;;  %v2339_v26 = vld [vmem:[%s3523_s1 + $0x414] sm:$0xf] }
  0x6e   :  { %1279 = vmatpush.bf16.msrb.mxu2 %v1980_v29  ;;  %v2257_v29 = vld [vmem:[%s3523_s1 + $0x184] sm:$0xf]  ;;  %v2137_v27 = vld [vmem:[%s3523_s1 + $0x418] sm:$0xf0] }
  0x6f   :  { %1298 = vmatpush.bf16.msrb.mxu3 %v2044_v54  ;;  %v2289_v54 = vld [vmem:[%s3523_s1 + $0x284] sm:$0xf] }
  0x70   :  { %1242 = vmatpush.bf16.msrb.mxu0 %v1844_v36  ;;  %v1812_v36 = vor.u32 %v2257_v29, %v1809_v48  ;;  %v1940_v40 = vor.u32 %v2289_v54, %v1937_v31  ;;  %v2321_v29 = vld [vmem:[%s3523_s1 + $0x384] sm:$0xf] }
  0x71   :  { %1261 = vmatpush.bf16.msrb.mxu1 %v1908_v37  ;;  %v2351_v37 = vld [vmem:[%s3523_s1 + $0x474] sm:$0xf] }
  0x72   :  { %1280 = vmatpush.bf16.msrb.mxu2 %v1972_v38  ;;  %v2185_v38 = vld [vmem:[%s3523_s1 + $0x478] sm:$0xf0] }
  0x73   :  { %1299 = vmatpush.bf16.msrb.mxu3 %v2036_v43  ;;  %1176 = vmatmul.bf16.gmra.mxu0 %v3281_v5  ;;  %v2188_v43 = vor.u32 %v2351_v37, %v2185_v38 }
  0x74   :  { %1243 = vmatpush.bf16.msrb.mxu0 %v1836_v59  ;;  %1195 = vmatmul.bf16.gmra.mxu1 %v2783_v44  ;;  %v1884_v44 = vor.u32 %v2275_v21, %v1881_v23  ;;  %v2331_v59 = vld [vmem:[%s3523_s1 + $0x3d4] sm:$0xf]  ;;  %v2145_v21 = vld [vmem:[%s3523_s1 + $0x428] sm:$0xf0] }
  0x75   :  { %1262 = vmatpush.bf16.msrb.mxu1 %v1900_v60  ;;  %1214 = vmatmul.bf16.gmra.mxu2 %v2794_v50  ;;  %v1948_v50 = vor.u32 %v2291_v24, %v1945_v25  ;;  %v2105_v60 = vld [vmem:[%s3523_s1 + $0x3d8] sm:$0xf0]  ;;  %v2148_v23 = vor.u32 %v2341_v20, %v2145_v21  ;;  %v2323_v24 = vld [vmem:[%s3523_s1 + $0x394] sm:$0xf] }
  0x76   :  { %1281 = vmatpush.bf16.msrb.mxu2 %v1964_v61  ;;  %1233 = vmatmul.bf16.gmra.mxu3 %v2796_v51  ;;  %v1873_v51 = vld [vmem:[%s3523_s1 + $0x208] sm:$0xf0]  ;;  %v2347_v61 = vld [vmem:[%s3523_s1 + $0x454] sm:$0xf]  ;;  %v2108_v2 = vor.u32 %v2331_v59, %v2105_v60  ;;  %v2073_v25 = vld [vmem:[%s3523_s1 + $0x398] sm:$0xf0] }
  0x77   :  { %1300 = vmatpush.bf16.msrb.mxu3 %v2028_v9  ;;  %v1876_v39 = vor.u32 %v2273_v53, %v1873_v51  ;;  %v2172_v4 = vor.u32 %v2347_v61, %v2169_v62  ;;  %v2097_v9 = vld [vmem:[%s3523_s1 + $0x3c8] sm:$0xf0] }
  0x78   :  { %1244 = vmatpush.bf16.msrb.mxu0 %v1828_v16  ;;  %v2092_v16 = vor.u32 %v2327_v12, %v2089_v13 }
  0x79   :  { %1263 = vmatpush.bf16.msrb.mxu1 %v1892_v17  ;;  %v2156_v17 = vor.u32 %v2343_v14, %v2153_v15 }
  0x7a   :  { %1282 = vmatpush.bf16.msrb.mxu2 %v1956_v18  ;;  %v2325_v18 = vld [vmem:[%s3523_s1 + $0x3a4] sm:$0xf] }
  0x7b   :  { %1301 = vmatpush.bf16.msrb.mxu3 %v2020_v22  ;;  %v2084_v22 = vor.u32 %v2325_v18, %v2081_v19 }
  0x7c   :  { %1245 = vmatpush.bf16.msrb.mxu0 %v1820_v28  ;;  %v2076_v28 = vor.u32 %v2323_v24, %v2073_v25 }
  0x7d   :  { %1264 = vmatpush.bf16.msrb.mxu1 %v1884_v44  ;;  %v2065_v44 = vld [vmem:[%s3523_s1 + $0x388] sm:$0xf0] }
  0x7e   :  { %1283 = vmatpush.bf16.msrb.mxu2 %v1948_v50 }
  0x7f   :  { %1302 = vmatpush.bf16.msrb.mxu3 %v2012_v30 }
  0x80   :  { %1246 = vmatpush.bf16.msrb.mxu0 %v1812_v36 }
  0x81   :  { %1265 = vmatpush.bf16.msrb.mxu1 %v1876_v39 }
  0x82   :  { %1284 = vmatpush.bf16.msrb.mxu2 %v1940_v40 }
  0x83   :  { %1303 = vmatpush.bf16.msrb.mxu3 %v2004_v41  ;;  %1247 = vmatmul.bf16.vlgmr.msrb.gmra.mxu0 %v2672_v57  ;;  %v2329_v57 = vld [vmem:[%s3523_s1 + $0x3c4] sm:$0xf] }
  0x84   :  { %1315 = vmatpush.bf16.msra.mxu0 %v2124_v42  ;;  %1266 = vmatmul.bf16.vlgmr.msrb.gmra.mxu1 %v2927_v58  ;;  %v2345_v58 = vld [vmem:[%s3523_s1 + $0x444] sm:$0xf] }
  0x85   :  { %1334 = vmatpush.bf16.msra.mxu1 %v2188_v43  ;;  %1285 = vmatmul.bf16.vlgmr.msrb.gmra.mxu2 %v2938_v63  ;;  %v2161_v63 = vld [vmem:[%s3523_s1 + $0x448] sm:$0xf0] }
  0x86   :  { %2353 = vmatpush.bf16.msra.mxu2 %v2124_v42  ;;  %1304 = vmatmul.bf16.vlgmr.msrb.gmra.mxu3 %v2940_v0  ;;  %v2100_v0 = vor.u32 %v2329_v57, %v2097_v9  ;;  %v2164_v10 = vor.u32 %v2345_v58, %v2161_v63 }
  0x87   :  { %2361 = vmatpush.bf16.msra.mxu3 %v2188_v43 }
  0x88   :  { %1316 = vmatpush.bf16.msra.mxu0 %v2116_v52 }
  0x89   :  { %1335 = vmatpush.bf16.msra.mxu1 %v2180_v55 }
  0x8a   :  { %2354 = vmatpush.bf16.msra.mxu2 %v2116_v52 }
  0x8b   :  { %2362 = vmatpush.bf16.msra.mxu3 %v2180_v55 }
  0x8c   :  { %1317 = vmatpush.bf16.msra.mxu0 %v2108_v2 }
  0x8d   :  { %1336 = vmatpush.bf16.msra.mxu1 %v2172_v4 }
  0x8e   :  { %2355 = vmatpush.bf16.msra.mxu2 %v2108_v2 }
  0x8f   :  { %2363 = vmatpush.bf16.msra.mxu3 %v2172_v4 }
  0x90   :  { %1318 = vmatpush.bf16.msra.mxu0 %v2100_v0 }
  0x91   :  { %1337 = vmatpush.bf16.msra.mxu1 %v2164_v10 }
  0x92   :  { %2356 = vmatpush.bf16.msra.mxu2 %v2100_v0 }
  0x93   :  { %2364 = vmatpush.bf16.msra.mxu3 %v2164_v10  ;;  %1252 = vmatmul.bf16.gmra.mxu0 %v2804_v56  ;;  %v2140_v56 = vor.u32 %v2339_v26, %v2137_v27 }
  0x94   :  { %1319 = vmatpush.bf16.msra.mxu0 %v2092_v16  ;;  %1271 = vmatmul.bf16.gmra.mxu1 %v3059_v1  ;;  %v2337_v1 = vld [vmem:[%s3523_s1 + $0x404] sm:$0xf] }
  0x95   :  { %1338 = vmatpush.bf16.msra.mxu1 %v2156_v17  ;;  %1290 = vmatmul.bf16.gmra.mxu2 %v3070_v7  ;;  %v2129_v7 = vld [vmem:[%s3523_s1 + $0x408] sm:$0xf0] }
  0x96   :  { %2357 = vmatpush.bf16.msra.mxu2 %v2092_v16  ;;  %1309 = vmatmul.bf16.gmra.mxu3 %v3072_v8  ;;  %v2068_v8 = vor.u32 %v2321_v29, %v2065_v44  ;;  %v2132_v50 = vor.u32 %v2337_v1, %v2129_v7 }
  0x97   :  { %2365 = vmatpush.bf16.msra.mxu3 %v2156_v17 }
  0x98   :  { %1320 = vmatpush.bf16.msra.mxu0 %v2084_v22 }
  0x99   :  { %1339 = vmatpush.bf16.msra.mxu1 %v2148_v23 }
  0x9a   :  { %2358 = vmatpush.bf16.msra.mxu2 %v2084_v22 }
  0x9b   :  { %2366 = vmatpush.bf16.msra.mxu3 %v2148_v23 }
  0x9c   :  { %1321 = vmatpush.bf16.msra.mxu0 %v2076_v28 }
  0x9d   :  { %1340 = vmatpush.bf16.msra.mxu1 %v2140_v56 }
  0x9e   :  { %2359 = vmatpush.bf16.msra.mxu2 %v2076_v28  ;;  %v3461_v28 = vld [vmem:[%s3525_s2] sm:$0x3] }
  0x9f   :  { %2367 = vmatpush.bf16.msra.mxu3 %v2140_v56  ;;  %v1355_v29 = vperm.slane %v3461_v28, 0 }
  0xa0   :  { %1322 = vmatpush.bf16.msra.mxu0 %v2068_v8  ;;  %v1020_v48 = vpop.f32.mrf.mxu0 }
  0xa1   :  { %1341 = vmatpush.bf16.msra.mxu1 %v2132_v50  ;;  %v1039_v53 = vpop.f32.mrf.mxu1 }
  0xa2   :  { %2360 = vmatpush.bf16.msra.mxu2 %v2068_v8  ;;  %v1040_v51 = vadd.f32 %v1039_v53, %v1020_v48  ;;  %v3467_v8 = vld [vmem:[%s3526_s3] sm:$0x3] }
  0xa3   :  { %2368 = vmatpush.bf16.msra.mxu3 %v2132_v50  ;;  %1323 = vmatmul.bf16.vlgmr.msra.gmra.mxu0 %v2948_v3 }
  0xa4   :  { %1342 = vmatmul.bf16.vlgmr.msra.gmra.mxu1 %v3173_v6 }
  0xa5   :  { %1328 = vmatmul.bf16.vlgmr.msra.gmra.mxu2 %v3080_v11 }
  0xa6   :  { %1347 = vmatmul.bf16.vlgmr.msra.gmra.mxu3 %v3281_v5 }
  0xa8   :  { %v1058_v30 = vpop.f32.mrf.mxu2  ;;  %v1022_v32 = vpop.f32.mrf.mxu0 }
  0xa9   :  { %v1059_v54 = vadd.f32 %v1058_v30, %v1040_v51  ;;  %v1077_v31 = vpop.f32.mrf.mxu3  ;;  %v1041_v33 = vpop.f32.mrf.mxu1  ;;  %v1369_v30 = vperm.slane %v3467_v8, 0 }
  0xaa   :  { %v1042_v35 = vadd.f32 %v1041_v33, %v1022_v32 }
  0xab   :  { %v1078_v34 = vadd.f32 %v1077_v31, %v1059_v54 }
  0xb0   :  { %v1060_v36 = vpop.f32.mrf.mxu2  ;;  %v1025_v39 = vpop.f32.mrf.mxu0 }
  0xb1   :  { %v1061_v37 = vadd.f32 %v1060_v36, %v1042_v35  ;;  %v1079_v38 = vpop.f32.mrf.mxu3  ;;  %v1044_v40 = vpop.f32.mrf.mxu1 }
  0xb2   :  { %v1045_v3 = vadd.f32 %v1044_v40, %v1025_v39  ;;  %v3478_v39 = vld [vmem:[%s3527_s4 + $0x8] sm:$0xff] }
  0xb3   :  { %v1080_v41 = vadd.f32 %v1079_v38, %v1061_v37  ;;  %v3473_v37 = vld [vmem:[%s3527_s4] sm:$0xff] }
  0xb8   :  { %v1063_v42 = vpop.f32.mrf.mxu2  ;;  %v1027_v6 = vpop.f32.mrf.mxu0 }
  0xb9   :  { %v1064_v11 = vadd.f32 %v1063_v42, %v1045_v3  ;;  %v1082_v43 = vpop.f32.mrf.mxu3  ;;  %v1046_v45 = vpop.f32.mrf.mxu1  ;;  %v1409_v3 = vunpack.c.l.bf16 %v3478_v39 }
  0xba   :  { %v1047_v46 = vadd.f32 %v1046_v45, %v1027_v6 }
  0xbb   :  { %v1083_v5 = vadd.f32 %v1082_v43, %v1064_v11 }
  0xc0   :  { %v1065_v47 = vpop.f32.mrf.mxu2  ;;  %v1096_v55 = vpop.f32.mrf.mxu0 }
  0xc1   :  { %v1066_v49 = vadd.f32 %v1065_v47, %v1047_v46  ;;  %v1084_v52 = vpop.f32.mrf.mxu3  ;;  %v1097_v59 = vadd.f32 %v1096_v55, %v1078_v34  ;;  %v1115_v60 = vpop.f32.mrf.mxu1 }
  0xc3   :  { %v1085_v61 = vadd.f32 %v1084_v52, %v1066_v49  ;;  %v1116_v62 = vadd.f32 %v1115_v60, %v1097_v59 }
  0xc8   :  { %v1134_v2 = vpop.f32.mrf.mxu2  ;;  %v1098_v9 = vpop.f32.mrf.mxu0 }
  0xc9   :  { %v1135_v4 = vadd.f32 %v1134_v2, %v1116_v62  ;;  %v1153_v57 = vpop.f32.mrf.mxu3  ;;  %v1099_v58 = vadd.f32 %v1098_v9, %v1080_v41  ;;  %v1117_v63 = vpop.f32.mrf.mxu1  ;;  %v1407_v41 = vunpack.c.l.bf16 %v3473_v37 }
  0xcb   :  { %v1154_v0 = vadd.f32 %v1153_v57, %v1135_v4  ;;  %v1118_v10 = vadd.f32 %v1117_v63, %v1099_v58 }
  0xd0   :  { %v1136_v12 = vpop.f32.mrf.mxu2  ;;  %v1101_v15 = vpop.f32.mrf.mxu0 }
  0xd1   :  { %v1137_v13 = vadd.f32 %v1136_v12, %v1118_v10  ;;  %v1155_v14 = vpop.f32.mrf.mxu3  ;;  %v1102_v16 = vadd.f32 %v1101_v15, %v1083_v5  ;;  %v1120_v17 = vpop.f32.mrf.mxu1 }
  0xd3   :  { %v1156_v18 = vadd.f32 %v1155_v14, %v1137_v13  ;;  %v1121_v19 = vadd.f32 %v1120_v17, %v1102_v16 }
  0xd8   :  { %v1139_v20 = vpop.f32.mrf.mxu2  ;;  %v1103_v23 = vpop.f32.mrf.mxu0 }
  0xd9   :  { %v1140_v21 = vadd.f32 %v1139_v20, %v1121_v19  ;;  %v1158_v22 = vpop.f32.mrf.mxu3  ;;  %v1104_v24 = vadd.f32 %v1103_v23, %v1085_v61  ;;  %v1122_v25 = vpop.f32.mrf.mxu1 }
  0xdb   :  { %v1159_v26 = vadd.f32 %v1158_v22, %v1140_v21  ;;  %v1123_v27 = vadd.f32 %v1122_v25, %v1104_v24 }
  0xe0   :  { %v1141_v56 = vpop.f32.mrf.mxu2  ;;  %v1172_v7 = vpop.f32.mrf.mxu0 }
  0xe1   :  { %v1142_v44 = vadd.f32 %v1141_v56, %v1123_v27  ;;  %v1160_v1 = vpop.f32.mrf.mxu3  ;;  %v1173_v50 = vadd.f32 %v1172_v7, %v1154_v0  ;;  %v1191_v48 = vpop.f32.mrf.mxu1 }
  0xe3   :  { %v1161_v53 = vadd.f32 %v1160_v1, %v1142_v44  ;;  %v1359_v51 = vmul.f32 %v1355_v29, %v1173_v50 }
  0xe5   :  { %v1373_v54 = vadd.f32 %v1369_v30, %v1359_v51 }
  0xe7   :  { %v1389_v36 = vmul.f32 0.2, %v1373_v54  ;;  %vm1381_vm0 = vcmp.gt.f32.partialorder %v1373_v54, 0.0 }
  0xe8   :  { %v1210_v31 = vpop.f32.mrf.mxu2  ;;  %v1174_v33 = vpop.f32.mrf.mxu0 }
  0xe9   :  { %v1229_v32 = vpop.f32.mrf.mxu3  ;;  %v1175_v34 = vadd.f32 %v1174_v33, %v1156_v18  ;;  %v1193_v35 = vpop.f32.mrf.mxu1  ;;  %v1397_v42 = vsel %vm1381_vm0, %v1373_v54, %v1389_v36  ;;  %v1211_v24 = vadd.f32 %v1210_v31, %v1191_v48  ;;  %v29_v48 = vlaneseq }
  0xea   :  { %v1411_v49 = vmul.f32 %v1407_v41, %v1397_v42 }
  0xeb   :  { %v1361_v38 = vmul.f32 %v1355_v29, %v1175_v34  ;;  %vm3486_vm4 = vcmp.lt.s32.totalorder %v29_v48, 256 }
  0xed   :  { %v1375_v40 = vadd.f32 %v1369_v30, %v1361_v38 }
  0xef   :  { %vm1383_vm1 = vcmp.gt.f32.partialorder %v1375_v40, 0.0  ;;  %v1391_v11 = vmul.f32 0.2, %v1375_v40 }
  0xf0   :  { %v1212_v43 = vpop.f32.mrf.mxu2  ;;  %v1177_v45 = vpop.f32.mrf.mxu0 }
  0xf1   :  { %v1231_v6 = vpop.f32.mrf.mxu3  ;;  %v1399_v5 = vsel %vm1383_vm1, %v1375_v40, %v1391_v11  ;;  %v1178_v46 = vadd.f32 %v1177_v45, %v1159_v26  ;;  %v1196_v47 = vpop.f32.mrf.mxu1  ;;  %v1213_v7 = vadd.f32 %v1212_v43, %v1193_v35 }
  0xf2   :  { %v1413_v52 = vmul.f32 %v1409_v3, %v1399_v5 }
  0xf3   :  { %v1363_v55 = vmul.f32 %v1355_v29, %v1178_v46  ;;  %v1232_v34 = vadd.f32 %v1231_v6, %v1213_v7  ;;  %v1356_v46 = vperm.slane %v3461_v28, 1  ;;  %v2378_v6 = vmov 0.0  }
  0xf4   :  { %v3482_v59 = vadd.f32 %v1413_v52, %v1411_v49  ;;  %33 = vst.msk [vmem:[#allocation2] sm:$0x3] %vm3486_vm4, %v2378_v6 }
  0xf5   :  { %v1377_v60 = vadd.f32 %v1369_v30, %v1363_v55  ;;  %34 = vst.msk [vmem:[#allocation2 + $0x2] sm:$0x3] %vm3486_vm4, %v2378_v6 }
  0xf7   :  { %v1393_v9 = vmul.f32 0.2, %v1377_v60  ;;  %vm1385_vm2 = vcmp.gt.f32.partialorder %v1377_v60, 0.0 }
  0xf8   :  { %v1215_v61 = vpop.f32.mrf.mxu2  ;;  %v1179_v2 = vpop.f32.mrf.mxu0 }
  0xf9   :  { %v1234_v62 = vpop.f32.mrf.mxu3  ;;  %v1180_v4 = vadd.f32 %v1179_v2, %v1161_v53  ;;  %v1198_v57 = vpop.f32.mrf.mxu1  ;;  %v1401_v0 = vsel %vm1385_vm2, %v1377_v60, %v1393_v9  ;;  %v1216_v1 = vadd.f32 %v1215_v61, %v1196_v47 }
  0xfa   :  { %v1415_v17 = vmul.f32 %v1407_v41, %v1401_v0 }
  0xfb   :  { %v1365_v58 = vmul.f32 %v1355_v29, %v1180_v4  ;;  %v1230_v29 = vadd.f32 %v1229_v32, %v1211_v24  ;;  %v1235_v33 = vadd.f32 %v1234_v62, %v1216_v1  ;;  %v1370_v62 = vperm.slane %v3467_v8, 1 }
  0xfc   :  { %v1420_v8 = vrot.slane %v3482_v59, 4 }
  0xfd   :  { %v1379_v63 = vadd.f32 %v1369_v30, %v1365_v58 }
  0xfe   :  { %v1421_v1 = vadd.f32 %v1420_v8, %v3482_v59 }
  0xff   :  { %vm1387_vm3 = vcmp.gt.f32.partialorder %v1379_v63, 0.0  ;;  %v1395_v10 = vmul.f32 0.2, %v1379_v63 }
 0x100   :  { %v1217_v12 = vpop.f32.mrf.mxu2  ;;  %v1248_v14 = vpop.f32.mrf.mxu0 }
 0x101   :  { %v1236_v13 = vpop.f32.mrf.mxu3  ;;  %v1403_v15 = vsel %vm1387_vm3, %v1379_v63, %v1395_v10  ;;  %v1267_v16 = vpop.f32.mrf.mxu1  ;;  %v1249_v44 = vadd.f32 %v1248_v14, %v1230_v29  ;;  %v1218_v41 = vadd.f32 %v1217_v12, %v1198_v57 }
 0x102   :  { %v1417_v18 = vmul.f32 %v1409_v3, %v1403_v15 }
 0x103   :  { %v1268_v30 = vadd.f32 %v1267_v16, %v1249_v44  ;;  %v1237_v47 = vadd.f32 %v1236_v13, %v1218_v41 }
 0x104   :  { %v3484_v19 = vadd.f32 %v1417_v18, %v1415_v17 }
 0x108   :  { %v1286_v20 = vpop.f32.mrf.mxu2  ;;  %v1250_v22 = vpop.f32.mrf.mxu0 }
 0x109   :  { %v1305_v21 = vpop.f32.mrf.mxu3  ;;  %v1269_v23 = vpop.f32.mrf.mxu1  ;;  %v1287_v36 = vadd.f32 %v1286_v20, %v1268_v30  ;;  %v1251_v40 = vadd.f32 %v1250_v22, %v1232_v34  ;;  %v1434_v34 = vrot.slane %v3484_v19, 4 }
 0x10b   :  { %v1306_v31 = vadd.f32 %v1305_v21, %v1287_v36  ;;  %v1270_v35 = vadd.f32 %v1269_v23, %v1251_v40  ;;  %v1408_v23 = vunpack.c.h.bf16 %v3473_v37  ;;  %v1422_v37 = vrot.slane %v1421_v1, 2 }
 0x10c   :  { %v1435_v48 = vadd.f32 %v1434_v34, %v3484_v19 }
 0x110   :  { %v1288_v25 = vpop.f32.mrf.mxu2  ;;  %v1253_v27 = vpop.f32.mrf.mxu0 }
 0x111   :  { %v1307_v26 = vpop.f32.mrf.mxu3  ;;  %v1272_v56 = vpop.f32.mrf.mxu1  ;;  %v1254_v38 = vadd.f32 %v1253_v27, %v1235_v33  ;;  %v1289_v52 = vadd.f32 %v1288_v25, %v1270_v35  ;;  %v1410_v25 = vunpack.c.h.bf16 %v3478_v39  ;;  %v11_v35 = vstv %s3528_s5 }
 0x112   :  { %12 = vst [vmem:[#allocation3] sm:$0x1] %v11_v35 }
 0x113   :  { %v1273_v42 = vadd.f32 %v1272_v56, %v1254_v38  ;;  %v1308_v4 = vadd.f32 %v1307_v26, %v1289_v52 }
 0x118   :  { %v1291_v50 = vpop.f32.mrf.mxu2  ;;  %v1255_v51 = vpop.f32.mrf.mxu0 }
 0x119   :  { %v1310_v53 = vpop.f32.mrf.mxu3  ;;  %v1274_v54 = vpop.f32.mrf.mxu1  ;;  %v1292_v49 = vadd.f32 %v1291_v50, %v1273_v42  ;;  %v1256_v60 = vadd.f32 %v1255_v51, %v1237_v47  ;;  %v1493_v45 = vld [vmem:[#allocation3] sm:$0x1] }
 0x11b   :  { %v1311_v2 = vadd.f32 %v1310_v53, %v1292_v49  ;;  %v1275_v9 = vadd.f32 %v1274_v54, %v1256_v60 }
 0x120   :  { %v1293_v3 = vpop.f32.mrf.mxu2  ;;  %v1324_v32 = vpop.f32.mrf.mxu0 }
 0x121   :  { %v1312_v11 = vpop.f32.mrf.mxu3  ;;  %v1325_v43 = vadd.f32 %v1324_v32, %v1306_v31  ;;  %v1343_v5 = vpop.f32.mrf.mxu1  ;;  %v1294_v12 = vadd.f32 %v1293_v3, %v1275_v9  ;;  %v1423_v3 = vadd.f32 %v1422_v37, %v1421_v1 }
 0x123   :  { %v1344_v55 = vadd.f32 %v1343_v5, %v1325_v43  ;;  %v1313_v20 = vadd.f32 %v1312_v11, %v1294_v12  ;;  %v1436_v43 = vrot.slane %v1435_v48, 2 }
 0x125   :  { %v1360_v61 = vmul.f32 %v1356_v46, %v1344_v55  ;;  %v1437_v52 = vadd.f32 %v1436_v43, %v1435_v48 }
 0x127   :  { %v1374_v0 = vadd.f32 %v1370_v62, %v1360_v61  ;;  %v1447_v61 = vld [vmem:[#allocation2] sm:$0x3] }
 0x128   :  { %v1329_v57 = vpop.f32.mrf.mxu2  ;;  %v1326_v63 = vpop.f32.mrf.mxu0 }
 0x129   :  { %v1330_v28 = vadd.f32 %v1329_v57, %v1311_v2  ;;  %v1348_v58 = vpop.f32.mrf.mxu3  ;;  %v1327_v10 = vadd.f32 %v1326_v63, %v1308_v4  ;;  %v1345_v14 = vpop.f32.mrf.mxu1  ;;  %v1390_v17 = vmul.f32 0.2, %v1374_v0  ;;  %vm1382_vm5 = vcmp.gt.f32.partialorder %v1374_v0, 0.0 }
 0x12a   :  { %v1438_v4 = vrot.slane %v1437_v52, 1 }
 0x12b   :  { %v1349_v13 = vadd.f32 %v1348_v58, %v1330_v28  ;;  %v1346_v15 = vadd.f32 %v1345_v14, %v1327_v10  ;;  %v1398_v27 = vsel %vm1382_vm5, %v1374_v0, %v1390_v17  ;;  %v1448_v0 = vld [vmem:[#allocation2 + $0x2] sm:$0x3] }
 0x12c   :  { %v1412_v50 = vmul.f32 %v1408_v23, %v1398_v27  ;;  %v1439_v58 = vadd.f32 %v1438_v4, %v1437_v52 }
 0x12d   :  { %v1364_v16 = vmul.f32 %v1356_v46, %v1349_v13  ;;  %v1362_v18 = vmul.f32 %v1356_v46, %v1346_v15 }
 0x12f   :  { %v1376_v21 = vadd.f32 %v1370_v62, %v1362_v18  ;;  %v1378_v24 = vadd.f32 %v1370_v62, %v1364_v16 }
 0x130   :  { %v1331_v22 = vpop.f32.mrf.mxu2 }
 0x131   :  { %v1332_v26 = vadd.f32 %v1331_v22, %v1313_v20  ;;  %vm1384_vm6 = vcmp.gt.f32.partialorder %v1376_v21, 0.0  ;;  %v1392_v56 = vmul.f32 0.2, %v1376_v21  ;;  %v1350_v29 = vpop.f32.mrf.mxu3  ;;  %v1394_v53 = vmul.f32 0.2, %v1378_v24 }
 0x132   :  { %vm1386_vm7 = vcmp.gt.f32.partialorder %v1378_v24, 0.0 }
 0x133   :  { %v1351_v44 = vadd.f32 %v1350_v29, %v1332_v26  ;;  %v1400_v7 = vsel %vm1384_vm6, %v1376_v21, %v1392_v56  ;;  %v1402_v39 = vsel %vm1386_vm7, %v1378_v24, %v1394_v53 }
 0x134   :  { %v1414_v51 = vmul.f32 %v1410_v25, %v1400_v7  ;;  %v1416_v59 = vmul.f32 %v1408_v23, %v1402_v39 }
 0x135   :  { %v1366_v30 = vmul.f32 %v1356_v46, %v1351_v44  ;;  %v1424_v46 = vrot.slane %v1423_v3, 1 }
 0x136   :  { %v1426_v54 = vadd.f32 %v1414_v51, %v1412_v50 }
 0x137   :  { %v1380_v33 = vadd.f32 %v1370_v62, %v1366_v30  ;;  %v1425_v19 = vadd.f32 %v1424_v46, %v1423_v3 }
 0x138   :  { %v1427_v36 = vrot.slane %v1426_v54, 4 }
 0x139   :  { %vm1388_vm8 = vcmp.gt.f32.partialorder %v1380_v33, 0.0  ;;  %v1396_v38 = vmul.f32 0.2, %v1380_v33 }
 0x13a   :  { %v1428_v40 = vadd.f32 %v1427_v36, %v1426_v54 }
 0x13b   :  { %v1404_v41 = vsel %vm1388_vm8, %v1380_v33, %v1396_v38 }
 0x13c   :  { %v1418_v31 = vmul.f32 %v1410_v25, %v1404_v41  ;;  %v1429_v42 = vrot.slane %v1428_v40, 2 }
 0x13e   :  { %v1440_v11 = vadd.f32 %v1418_v31, %v1416_v59  ;;  %v1430_v32 = vadd.f32 %v1429_v42, %v1428_v40 }
 0x140   :  { %v1441_v5 = vrot.slane %v1440_v11, 4  ;;  %v1431_v6 = vrot.slane %v1430_v32, 1 }
 0x142   :  { %v1442_v47 = vadd.f32 %v1441_v5, %v1440_v11  ;;  %v1432_v49 = vadd.f32 %v1431_v6, %v1430_v32 }
 0x144   :  { %v1443_v55 = vrot.slane %v1442_v47, 2  ;;  %v1453_v60 = vrot.slane %v1432_v49, 7 }
 0x146   :  { %v1444_v62 = vadd.f32 %v1443_v55, %v1442_v47  ;;  %v1456_v2 = vsel %vm1455_vm9, %v1425_v19, %v1453_v60 }
 0x147   :  { %v1460_v9 = vadd.f32 %v1456_v2, %v1447_v61 }
 0x148   :  { %v1445_v57 = vrot.slane %v1444_v62, 1 }
 0x149   :  { %1466 = vst.msk [vmem:[#allocation2] sm:$0x3] %vm3486_vm4, %v1460_v9 }
 0x14a   :  { %v1446_v28 = vadd.f32 %v1445_v57, %v1444_v62 }
 0x14c   :  { %v1454_v63 = vrot.slane %v1446_v28, 7 }
 0x14e   :  { %v1457_v10 = vsel %vm1455_vm9, %v1439_v58, %v1454_v63 }
 0x14f   :  { %v1461_v12 = vadd.f32 %v1457_v10, %v1448_v0 }
 0x150   :  { %v1471_v13 = vld [vmem:[#allocation2] sm:$0x3] }
 0x151   :  { %1467 = vst.msk [vmem:[#allocation2 + $0x2] sm:$0x3] %vm3486_vm4, %v1461_v12  ;;  %v1475_v14 = vperm.slane %v1471_v13, 0  ;;  %v1476_v15 = vperm.slane %v1471_v13, 1 }
 0x153   :  { %v1483_v16 = vsel %vm1455_vm9, %v1475_v14, 0.0  ;;  %v1484_v17 = vsel %vm1455_vm9, %v1476_v15, 0.0 }
 0x154   :  { %v1485_v18 = vadd.f32 %v1484_v17, %v1483_v16 }
 0x156   :  { %1486 = vadd.xlane.f32.xlu0 %v1485_v18 }
 0x158   :  { %v1472_v20 = vld [vmem:[#allocation2 + $0x2] sm:$0x3] }
 0x159   :  { %v1477_v8 = vperm.slane %v1472_v20, 0  ;;  %v1478_v21 = vperm.slane %v1472_v20, 1 }
 0x15b   :  { %v1488_v22 = vsel %vm1455_vm9, %v1477_v8, 0.0  ;;  %v1489_v23 = vsel %vm1455_vm9, %v1478_v21, 0.0 }
 0x15c   :  { %v1490_v24 = vadd.f32 %v1489_v23, %v1488_v22 }
 0x15e   :  { %1491 = vadd.xlane.f32.xlu0 %v1490_v24 }
 0x1c9   :  { %v1487_v25 = vpop.xlane.xlu0 %1486 }
 0x1ca   :  { %v1494_v26 = vadd.f32 %v1493_v45, %v1487_v25 }
 0x1cc   :  { %v2189_v27 = vmul.f32 -1.442695, %v1494_v26 }
 0x1ce   :  { %2370 = vpow2.f32 %v2189_v27 }
 0x1d1   :  { %v1492_v56 = vpop.xlane.xlu0 %1491 }
 0x1d2   :  { %v1495_v29 = vadd.f32 %v1493_v45, %v1492_v56 }
 0x1d4   :  { %v2371_v44 = vpop.eup %2370  ;;  %v2190_v1 = vmul.f32 -1.442695, %v1495_v29 }
 0x1d5   :  { %v1502_v7 = vadd.f32 1.0, %v2371_v44 }
 0x1d6   :  { %2372 = vpow2.f32 %v2190_v1 }
 0x1d7   :  { %2374 = vrcp.f32 %v1502_v7  ;;  %v1515_v33 = vand.u32 2147483648, %v1502_v7  ;;  %v1513_v34 = vand.u32 2147483647, %v1502_v7  ;;  %vm1509_vm11 = vweird.f32 %v1502_v7 }
 0x1d9   :  { %v1516_v38 = vor.u32 1.1754944e-38, %v1515_v33  ;;  %vm1514_vm14 = vcmp.eq.f32.partialorder %v1513_v34, 8.507059e+37 }
 0x1dc   :  { %v2373_v50 = vpop.eup %2372 }
 0x1dd   :  { %v2375_v53 = vpop.eup %2374  ;;  %v1503_v51 = vadd.f32 1.0, %v2373_v50 }
 0x1de   :  { %v1505_v30 = vmul.f32 %v2375_v53, %v1502_v7  ;;  %vm1510_vm10 = vweird.f32 %v2375_v53 }
 0x1df   :  { %2376 = vrcp.f32 %v1503_v51  ;;  %vm1511_vm13 = vmor %vm1509_vm11, %vm1510_vm10  ;;  %v1530_v31 = vand.u32 2147483648, %v1503_v51  ;;  %v1528_v42 = vand.u32 2147483647, %v1503_v51  ;;  %vm1524_vm0 = vweird.f32 %v1503_v51 }
 0x1e0   :  { %v1506_v54 = vsub.f32 1.0, %v1505_v30 }
 0x1e1   :  { %v1531_v32 = vor.u32 1.1754944e-38, %v1530_v31  ;;  %vm1529_vm2 = vcmp.eq.f32.partialorder %v1528_v42, 8.507059e+37 }
 0x1e2   :  { %v1507_v37 = vmul.f32 %v2375_v53, %v1506_v54 }
 0x1e4   :  { %v1508_v39 = vadd.f32 %v2375_v53, %v1507_v37 }
 0x1e5   :  { %v2377_v36 = vpop.eup %2376 }
 0x1e6   :  { %v1512_v40 = vsel %vm1511_vm13, %v2375_v53, %v1508_v39  ;;  %v1520_v41 = vmul.f32 %v2377_v36, %v1503_v51  ;;  %vm1525_vm15 = vweird.f32 %v2377_v36 }
 0x1e7   :  { %v1517_v48 = vsel %vm1514_vm14, %v1516_v38, %v1512_v40  ;;  %vm1526_vm1 = vmor %vm1524_vm0, %vm1525_vm15 }
 0x1e8   :  { %1535 = vst.msk [vmem:[%s3529_s6] sm:$0x1] %vm1534_vm12, %v1517_v48  ;;  %v1521_v59 = vsub.f32 1.0, %v1520_v41 }
 0x1ea   :  { %v1522_v3 = vmul.f32 %v2377_v36, %v1521_v59 }
 0x1ec   :  { %v1523_v11 = vadd.f32 %v2377_v36, %v1522_v3 }
 0x1ee   :  { %v1527_v35 = vsel %vm1526_vm1, %v2377_v36, %v1523_v11 }
 0x1ef   :  { %v1532_v43 = vsel %vm1529_vm2, %v1531_v32, %v1527_v35 }
 0x1f0   :  { %1536 = vst.msk [vmem:[%s3529_s6 + $0x1] sm:$0x1] %vm1534_vm12, %v1532_v43 }

</bundles_post_ra>
